<compile_context>
chip_gen: v7x
topology: tpu7x:2x2x1
jax: 0.10.0
libtpu: 0.0.40
codegen_flags: <defaults>
</compile_context>

<pallas_src>
import jax
import jax.numpy as jnp
from jax.experimental import pallas as pl
from jax.experimental.pallas import tpu as pltpu

N_NEIGH = 6     # number of neighbour vehicles (fixed by the module: repeat(1, 6, 1))
D_IN = 128      # per-neighbour feature width
HIDDEN = 128    # LSTMCell hidden size (x2 / x3 width)
DEC = 64        # layer1 output size


def _leaky(v):
    # nn.LeakyReLU default negative_slope = 0.01
    return jnp.where(v > 0, v, 0.01 * v)


def _sigmoid(v):
    return 1.0 / (1.0 + jnp.exp(-v))


def _decoder_kernel(
    x1_ref,     # (6, TB, 128) neighbour-major neighbour features
    x2_ref,     # (TB, 128)    h0 (also the "self vehicle" features)
    x3_ref,     # (TB, 128)    c0
    x4_ref,     # (TB, 128)
    w1a_ref,    # (128, 128)   attn Linear1, x1-feature half   (pre-transposed)
    w1b_ref,    # (128, 128)   attn Linear1, self-feature half (pre-transposed)
    b1_ref,     # (1, 128)
    w2_ref,     # (128, 1)     attn Linear2 (pre-transposed)
    b2_ref,     # (1, 1)
    wl1a_ref,   # (128, 64)    layer1, x4 half          (pre-transposed)
    wl1b_ref,   # (128, 64)    layer1, aggregation half (pre-transposed)
    bl1_ref,    # (1, 64)
    wih_ref,    # (64, 512)    LSTM W_ih^T
    whh_ref,    # (128, 512)   LSTM W_hh^T
    blstm_ref,  # (1, 512)     LSTM b_ih + b_hh
    att_ref,    # out (TB, 6)  softmax attention weights
    h_ref,      # out (TB, 128) H0
    c_ref,      # out (TB, 128) C0
):
    f32 = jnp.float32
    n_neigh, tb, _ = x1_ref.shape
    hidden = x2_ref.shape[1]

    x2 = x2_ref[...]                                            # (TB, 128)
    x1_list = [x1_ref[n] for n in range(n_neigh)]               # n x (TB, 128)
    x_all = jnp.concatenate(x1_list, axis=0)                    # (n*TB, 128)

    # ---- attention MLP: LeakyReLU(cat([x1, self]) @ W1^T + b1) -----------
    # cat(...) @ W1^T == x1 @ W1a + self @ W1b (weights pre-split/transposed)
    u = jnp.dot(x2, w1b_ref[...], preferred_element_type=f32) + b1_ref[...]
    u_rep = jnp.concatenate([u] * n_neigh, axis=0)              # (n*TB, 128)
    h1 = _leaky(jnp.dot(x_all, w1a_ref[...], preferred_element_type=f32) + u_rep)

    # ---- LeakyReLU(h1 @ W2^T + b2): one score per (batch row, neighbour) --
    s_all = _leaky(jnp.dot(h1, w2_ref[...], preferred_element_type=f32)
                   + b2_ref[...])                               # (n*TB, 1)
    s_cols = [s_all[n * tb:(n + 1) * tb] for n in range(n_neigh)]   # (TB,1)

    # ---- softmax over the neighbour axis (numerically stable) ------------
    m = s_cols[0]
    for n in range(1, n_neigh):
        m = jnp.maximum(m, s_cols[n])
    e_cols = [jnp.exp(s - m) for s in s_cols]
    denom = e_cols[0]
    for n in range(1, n_neigh):
        denom = denom + e_cols[n]
    att_cols = [e / denom for e in e_cols]                      # (TB, 1) each

    # ---- attention-weighted aggregation of x1 ----------------------------
    agg = att_cols[0] * x1_list[0]
    for n in range(1, n_neigh):
        agg = agg + att_cols[n] * x1_list[n]                    # (TB, 128)

    # ---- layer1 + LeakyReLU: cat([x4, agg]) @ Wl1^T + bl1 ----------------
    xt = _leaky(jnp.dot(x4_ref[...], wl1a_ref[...], preferred_element_type=f32)
                + jnp.dot(agg, wl1b_ref[...], preferred_element_type=f32)
                + bl1_ref[...])                                 # (TB, 64)

    # ---- LSTMCell(64, 128); PyTorch gate order: i, f, g, o ---------------
    gates = (jnp.dot(xt, wih_ref[...], preferred_element_type=f32)
             + jnp.dot(x2, whh_ref[...], preferred_element_type=f32)
             + blstm_ref[...])                                  # (TB, 512)
    i_g = _sigmoid(gates[:, 0:hidden])
    f_g = _sigmoid(gates[:, hidden:2 * hidden])
    g_g = jnp.tanh(gates[:, 2 * hidden:3 * hidden])
    o_g = _sigmoid(gates[:, 3 * hidden:4 * hidden])
    c_new = f_g * x3_ref[...] + i_g * g_g
    h_new = o_g * jnp.tanh(c_new)

    # ---- assemble the (TB, 6) attention row (no minor-dim concat needed) --
    lane = jax.lax.broadcasted_iota(jnp.int32, (tb, n_neigh), 1)
    att_out = jnp.zeros((tb, n_neigh), dtype=f32)
    for n in range(n_neigh):
        att_out = jnp.where(lane == n, att_cols[n], att_out)

    att_ref[...] = att_out.astype(att_ref.dtype)
    h_ref[...] = h_new.astype(h_ref.dtype)
    c_ref[...] = c_new.astype(c_ref.dtype)


def attention_decoder_forward(x1, x2, x3, x4, params):
    """x1:(B,6,128) x2:(B,128) x3:(B,128) x4:(B,128); params in PyTorch layout."""
    B, n_neigh, d = x1.shape
    hidden = x2.shape[1]
    assert (n_neigh, d, hidden) == (N_NEIGH, D_IN, HIDDEN)

    # ---------------- layout glue (transpose / split / reshape) -----------
    x1_nm = jnp.transpose(x1, (1, 0, 2))                        # (6, B, 128)
    w1 = params["attn_w1"]                                      # (128, 256)
    w1a = jnp.transpose(w1[:, :d])                              # (128, 128)
    w1b = jnp.transpose(w1[:, d:])                              # (128, 128)
    b1 = params["attn_b1"].reshape(1, -1)                       # (1, 128)
    w2 = jnp.transpose(params["attn_w2"])                       # (128, 1)
    b2 = params["attn_b2"].reshape(1, 1)                        # (1, 1)
    wl1 = params["layer1_w"]                                    # (64, 256)
    wl1a = jnp.transpose(wl1[:, :d])                            # (128, 64)
    wl1b = jnp.transpose(wl1[:, d:])                            # (128, 64)
    bl1 = params["layer1_b"].reshape(1, -1)                     # (1, 64)
    wih = jnp.transpose(params["lstm_w_ih"])                    # (64, 512)
    whh = jnp.transpose(params["lstm_w_hh"])                    # (128, 512)
    blstm = (params["lstm_b_ih"] + params["lstm_b_hh"]).reshape(1, -1)   # (1, 512)

    # batch tiling: one block for small B, else 128-row tiles; the batch axis
    # is independent per tile -> "parallel" (sharded across v7x's 2 TCs).
    tb = B if B <= 128 else 128
    assert B % tb == 0, "pad the batch to a multiple of 8 / of the tile first"
    grid = (B // tb,)

    # advisory cost estimate so XLA can schedule/overlap this small call
    flops = int(B * (2 * n_neigh * 2 * d * hidden        # attn Linear1
                     + 2 * n_neigh * hidden              # attn Linear2
                     + 2 * n_neigh * d                   # aggregation
                     + 2 * 2 * d * DEC                   # layer1
                     + 2 * (DEC + hidden) * 4 * hidden)) # LSTM gates
    transcendentals = int(B * (n_neigh + 5 * hidden))
    param_bytes = 4 * int(w1a.size + w1b.size + b1.size + w2.size + b2.size
                          + wl1a.size + wl1b.size + bl1.size
                          + wih.size + whh.size + blstm.size)
    io_bytes = 4 * int(x1.size + x2.size + x3.size + x4.size
                       + B * (n_neigh + 2 * hidden))
    cost = pl.CostEstimate(flops=flops, transcendentals=transcendentals,
                           bytes_accessed=param_bytes + io_bytes)

    att, h_new, c_new = pl.pallas_call(
        _decoder_kernel,
        out_shape=(
            jax.ShapeDtypeStruct((B, n_neigh), jnp.float32),
            jax.ShapeDtypeStruct((B, hidden), jnp.float32),
            jax.ShapeDtypeStruct((B, hidden), jnp.float32),
        ),
        grid=grid,
        in_specs=[
            pl.BlockSpec((n_neigh, tb, d), lambda i: (0, i, 0)),   # x1 (neigh-major)
            pl.BlockSpec((tb, hidden), lambda i: (i, 0)),          # x2 / h0
            pl.BlockSpec((tb, hidden), lambda i: (i, 0)),          # x3 / c0
            pl.BlockSpec((tb, d), lambda i: (i, 0)),               # x4
            pl.BlockSpec((d, hidden), lambda i: (0, 0)),           # w1a
            pl.BlockSpec((d, hidden), lambda i: (0, 0)),           # w1b
            pl.BlockSpec((1, hidden), lambda i: (0, 0)),           # b1
            pl.BlockSpec((hidden, 1), lambda i: (0, 0)),           # w2
            pl.BlockSpec((1, 1), lambda i: (0, 0)),                # b2
            pl.BlockSpec((d, DEC), lambda i: (0, 0)),              # wl1a
            pl.BlockSpec((d, DEC), lambda i: (0, 0)),              # wl1b
            pl.BlockSpec((1, DEC), lambda i: (0, 0)),              # bl1
            pl.BlockSpec((DEC, 4 * hidden), lambda i: (0, 0)),     # W_ih^T
            pl.BlockSpec((hidden, 4 * hidden), lambda i: (0, 0)),  # W_hh^T
            pl.BlockSpec((1, 4 * hidden), lambda i: (0, 0)),       # b_ih + b_hh
        ],
        out_specs=(
            pl.BlockSpec((tb, n_neigh), lambda i: (i, 0)),
            pl.BlockSpec((tb, hidden), lambda i: (i, 0)),
            pl.BlockSpec((tb, hidden), lambda i: (i, 0)),
        ),
        compiler_params=pltpu.CompilerParams(
            dimension_semantics=("parallel",),
        ),
        cost_estimate=cost,
    )(x1_nm, x2, x3, x4, w1a, w1b, b1, w2, b2, wl1a, wl1b, bl1, wih, whh, blstm)

    # PyTorch returns attention_score transposed to (B, 1, 6)
    return att.reshape(B, 1, n_neigh), h_new, c_new


def attention_decoder_reference(x1, x2, x3, x4, p):
    """Pure-JAX mirror of the PyTorch forward (for the correctness check)."""
    self_veh = jnp.repeat(x2[:, None, :], N_NEIGH, axis=1)             # (B,6,128)
    x = jnp.concatenate([x1, self_veh], axis=2)                        # (B,6,256)
    h = _leaky(jnp.einsum("bnk,ok->bno", x, p["attn_w1"]) + p["attn_b1"])
    s = _leaky(jnp.einsum("bnk,ok->bno", h, p["attn_w2"]) + p["attn_b2"])
    att = jax.nn.softmax(s, axis=1)                                    # (B,6,1)
    att_t = jnp.swapaxes(att, 1, 2)                                    # (B,1,6)
    agg = jnp.matmul(att_t, x1)[:, 0, :]                               # (B,128)
    dec_in = jnp.concatenate([x4, agg], axis=1)                        # (B,256)
    xt = _leaky(dec_in @ p["layer1_w"].T + p["layer1_b"])              # (B,64)
    gates = (xt @ p["lstm_w_ih"].T + p["lstm_b_ih"]
             + x2 @ p["lstm_w_hh"].T + p["lstm_b_hh"])                 # (B,512)
    i = jax.nn.sigmoid(gates[:, 0:HIDDEN])
    f = jax.nn.sigmoid(gates[:, HIDDEN:2 * HIDDEN])
    g = jnp.tanh(gates[:, 2 * HIDDEN:3 * HIDDEN])
    o = jax.nn.sigmoid(gates[:, 3 * HIDDEN:4 * HIDDEN])
    c_new = f * x3 + i * g
    h_new = o * jnp.tanh(c_new)
    return att_t, h_new, c_new


if __name__ == "__main__":
    key = jax.random.PRNGKey(0)
    ks = jax.random.split(key, 14)

    def _uniform(k, shape, fan_in):
        bound = 1.0 / (fan_in ** 0.5)       # PyTorch-style init bound
        return jax.random.uniform(k, shape, jnp.float32, -bound, bound)

    B = 8
    params = {
        "attn_w1": _uniform(ks[0], (HIDDEN, 2 * D_IN), 2 * D_IN),    # (128,256)
        "attn_b1": _uniform(ks[1], (HIDDEN,), 2 * D_IN),
        "attn_w2": _uniform(ks[2], (1, HIDDEN), HIDDEN),             # (1,128)
        "attn_b2": _uniform(ks[3], (1,), HIDDEN),
        "layer1_w": _uniform(ks[4], (DEC, 2 * D_IN), 2 * D_IN),      # (64,256)
        "layer1_b": _uniform(ks[5], (DEC,), 2 * D_IN),
        "lstm_w_ih": _uniform(ks[6], (4 * HIDDEN, DEC), HIDDEN),     # (512,64)
        "lstm_w_hh": _uniform(ks[7], (4 * HIDDEN, HIDDEN), HIDDEN),  # (512,128)
        "lstm_b_ih": _uniform(ks[8], (4 * HIDDEN,), HIDDEN),
        "lstm_b_hh": _uniform(ks[9], (4 * HIDDEN,), HIDDEN),
    }
    x1 = jax.random.normal(ks[10], (B, N_NEIGH, D_IN), jnp.float32)
    x2 = jax.random.normal(ks[11], (B, HIDDEN), jnp.float32)
    x3 = jax.random.normal(ks[12], (B, HIDDEN), jnp.float32)
    x4 = jax.random.normal(ks[13], (B, D_IN), jnp.float32)

    att, h0, c0 = attention_decoder_forward(x1, x2, x3, x4, params)
    att, h0, c0 = jax.block_until_ready((att, h0, c0))

    ref_att, ref_h, ref_c = attention_decoder_reference(x1, x2, x3, x4, params)

    assert att.shape == (B, 1, N_NEIGH)
    assert h0.shape == (B, HIDDEN) and c0.shape == (B, HIDDEN)
    # tolerance accounts for MXU f32-emulation vs XLA matmul precision modes
    assert jnp.allclose(att, ref_att, atol=1e-3, rtol=1e-3)
    assert jnp.allclose(h0, ref_h, atol=1e-3, rtol=1e-3)
    assert jnp.allclose(c0, ref_c, atol=1e-3, rtol=1e-3)

    print("KERNEL_OK")
</pallas_src>

<mosaic_0001>
module attributes {stable_mosaic.version = 11 : i64} {
  func.func @_decoder_kernel(%arg0: i32, %arg1: memref<6x8x128xf32, #tpu.memory_space<vmem>>, %arg2: memref<8x128xf32, #tpu.memory_space<vmem>>, %arg3: memref<8x128xf32, #tpu.memory_space<vmem>>, %arg4: memref<8x128xf32, #tpu.memory_space<vmem>>, %arg5: memref<128x128xf32, #tpu.memory_space<vmem>>, %arg6: memref<128x128xf32, #tpu.memory_space<vmem>>, %arg7: memref<1x128xf32, #tpu.memory_space<vmem>>, %arg8: memref<128x1xf32, #tpu.memory_space<vmem>>, %arg9: memref<1x1xf32, #tpu.memory_space<vmem>>, %arg10: memref<128x64xf32, #tpu.memory_space<vmem>>, %arg11: memref<128x64xf32, #tpu.memory_space<vmem>>, %arg12: memref<1x64xf32, #tpu.memory_space<vmem>>, %arg13: memref<64x512xf32, #tpu.memory_space<vmem>>, %arg14: memref<128x512xf32, #tpu.memory_space<vmem>>, %arg15: memref<1x512xf32, #tpu.memory_space<vmem>>, %arg16: memref<8x6xf32, #tpu.memory_space<vmem>>, %arg17: memref<8x128xf32, #tpu.memory_space<vmem>>, %arg18: memref<8x128xf32, #tpu.memory_space<vmem>>) attributes {dimension_semantics = [#tpu.dimension_semantics<parallel>], iteration_bounds = array<i64: 1>, scalar_prefetch = 0 : i64, scratch_operands = 0 : i64, tpu.core_type = #tpu.core_type<tc>, window_params = [{transform_indices = @transform_0, window_bounds = array<i64: 6, 8, 128>}, {transform_indices = @transform_1, window_bounds = array<i64: 8, 128>}, {transform_indices = @transform_2, window_bounds = array<i64: 8, 128>}, {transform_indices = @transform_3, window_bounds = array<i64: 8, 128>}, {pipeline_mode = #tpu.pipeline_mode<synchronous>, transform_indices = @transform_4, window_bounds = array<i64: 128, 128>}, {pipeline_mode = #tpu.pipeline_mode<synchronous>, transform_indices = @transform_5, window_bounds = array<i64: 128, 128>}, {pipeline_mode = #tpu.pipeline_mode<synchronous>, transform_indices = @transform_6, window_bounds = array<i64: 1, 128>}, {pipeline_mode = #tpu.pipeline_mode<synchronous>, transform_indices = @transform_7, window_bounds = array<i64: 128, 1>}, {pipeline_mode = #tpu.pipeline_mode<synchronous>, transform_indices = @transform_8, window_bounds = array<i64: 1, 1>}, {pipeline_mode = #tpu.pipeline_mode<synchronous>, transform_indices = @transform_9, window_bounds = array<i64: 128, 64>}, {pipeline_mode = #tpu.pipeline_mode<synchronous>, transform_indices = @transform_10, window_bounds = array<i64: 128, 64>}, {pipeline_mode = #tpu.pipeline_mode<synchronous>, transform_indices = @transform_11, window_bounds = array<i64: 1, 64>}, {pipeline_mode = #tpu.pipeline_mode<synchronous>, transform_indices = @transform_12, window_bounds = array<i64: 64, 512>}, {pipeline_mode = #tpu.pipeline_mode<synchronous>, transform_indices = @transform_13, window_bounds = array<i64: 128, 512>}, {pipeline_mode = #tpu.pipeline_mode<synchronous>, transform_indices = @transform_14, window_bounds = array<i64: 1, 512>}, {transform_indices = @transform_15, window_bounds = array<i64: 8, 6>}, {transform_indices = @transform_16, window_bounds = array<i64: 8, 128>}, {transform_indices = @transform_17, window_bounds = array<i64: 8, 128>}]} {
    %c0 = arith.constant 0 : index
    %c0_0 = arith.constant 0 : index
    %0 = vector.load %arg2[%c0, %c0_0] : memref<8x128xf32, #tpu.memory_space<vmem>>, vector<8x128xf32>
    %c0_1 = arith.constant 0 : index
    %c0_2 = arith.constant 0 : index
    %c0_3 = arith.constant 0 : index
    %1 = vector.load %arg1[%c0_1, %c0_2, %c0_3] : memref<6x8x128xf32, #tpu.memory_space<vmem>>, vector<1x8x128xf32>
    %2 = vector.shape_cast %1 : vector<1x8x128xf32> to vector<8x128xf32>
    %c1 = arith.constant 1 : index
    %c0_4 = arith.constant 0 : index
    %c0_5 = arith.constant 0 : index
    %3 = vector.load %arg1[%c1, %c0_4, %c0_5] : memref<6x8x128xf32, #tpu.memory_space<vmem>>, vector<1x8x128xf32>
    %4 = vector.shape_cast %3 : vector<1x8x128xf32> to vector<8x128xf32>
    %c2 = arith.constant 2 : index
    %c0_6 = arith.constant 0 : index
    %c0_7 = arith.constant 0 : index
    %5 = vector.load %arg1[%c2, %c0_6, %c0_7] : memref<6x8x128xf32, #tpu.memory_space<vmem>>, vector<1x8x128xf32>
    %6 = vector.shape_cast %5 : vector<1x8x128xf32> to vector<8x128xf32>
    %c3 = arith.constant 3 : index
    %c0_8 = arith.constant 0 : index
    %c0_9 = arith.constant 0 : index
    %7 = vector.load %arg1[%c3, %c0_8, %c0_9] : memref<6x8x128xf32, #tpu.memory_space<vmem>>, vector<1x8x128xf32>
    %8 = vector.shape_cast %7 : vector<1x8x128xf32> to vector<8x128xf32>
    %c4 = arith.constant 4 : index
    %c0_10 = arith.constant 0 : index
    %c0_11 = arith.constant 0 : index
    %9 = vector.load %arg1[%c4, %c0_10, %c0_11] : memref<6x8x128xf32, #tpu.memory_space<vmem>>, vector<1x8x128xf32>
    %10 = vector.shape_cast %9 : vector<1x8x128xf32> to vector<8x128xf32>
    %c5 = arith.constant 5 : index
    %c0_12 = arith.constant 0 : index
    %c0_13 = arith.constant 0 : index
    %11 = vector.load %arg1[%c5, %c0_12, %c0_13] : memref<6x8x128xf32, #tpu.memory_space<vmem>>, vector<1x8x128xf32>
    %12 = vector.shape_cast %11 : vector<1x8x128xf32> to vector<8x128xf32>
    %13 = tpu.concatenate %2, %4, %6, %8, %10, %12 in 0 : vector<8x128xf32>, vector<8x128xf32>, vector<8x128xf32>, vector<8x128xf32>, vector<8x128xf32>, vector<8x128xf32> -> vector<48x128xf32>
    %c0_14 = arith.constant 0 : index
    %c0_15 = arith.constant 0 : index
    %14 = vector.load %arg6[%c0_14, %c0_15] : memref<128x128xf32, #tpu.memory_space<vmem>>, vector<128x128xf32>
    %cst = arith.constant dense<0.000000e+00> : vector<8x128xf32>
    %15 = tpu.matmul %0, %14, %cst {dimension_numbers = #tpu.dot_dimension_numbers<[1], [0], [0], [1], [0, 0, 1, 1], [], []>} : vector<8x128xf32>, vector<128x128xf32>, vector<8x128xf32> -> vector<8x128xf32>
    %c0_16 = arith.constant 0 : index
    %c0_17 = arith.constant 0 : index
    %16 = vector.load %arg7[%c0_16, %c0_17] : memref<1x128xf32, #tpu.memory_space<vmem>>, vector<1x128xf32>
    %17 = vector.broadcast %16 : vector<1x128xf32> to vector<8x128xf32>
    %18 = arith.addf %15, %17 : vector<8x128xf32>
    %19 = tpu.concatenate %18, %18, %18, %18, %18, %18 in 0 : vector<8x128xf32>, vector<8x128xf32>, vector<8x128xf32>, vector<8x128xf32>, vector<8x128xf32>, vector<8x128xf32> -> vector<48x128xf32>
    %c0_18 = arith.constant 0 : index
    %c0_19 = arith.constant 0 : index
    %20 = vector.load %arg5[%c0_18, %c0_19] : memref<128x128xf32, #tpu.memory_space<vmem>>, vector<128x128xf32>
    %cst_20 = arith.constant dense<0.000000e+00> : vector<48x128xf32>
    %21 = tpu.matmul %13, %20, %cst_20 {dimension_numbers = #tpu.dot_dimension_numbers<[1], [0], [0], [1], [0, 0, 1, 1], [], []>} : vector<48x128xf32>, vector<128x128xf32>, vector<48x128xf32> -> vector<48x128xf32>
    %22 = arith.addf %21, %19 : vector<48x128xf32>
    %cst_21 = arith.constant 0.000000e+00 : f32
    %23 = vector.broadcast %cst_21 : f32 to vector<48x128xf32>
    %24 = arith.cmpf ogt, %22, %23 : vector<48x128xf32>
    %cst_22 = arith.constant 0.00999999977 : f32
    %25 = vector.broadcast %cst_22 : f32 to vector<48x128xf32>
    %26 = arith.mulf %25, %22 : vector<48x128xf32>
    %27 = arith.select %24, %22, %26 : vector<48x128xi1>, vector<48x128xf32>
    %c0_23 = arith.constant 0 : index
    %c0_24 = arith.constant 0 : index
    %28 = vector.load %arg8[%c0_23, %c0_24] : memref<128x1xf32, #tpu.memory_space<vmem>>, vector<128x1xf32>
    %cst_25 = arith.constant dense<0.000000e+00> : vector<48x1xf32>
    %29 = tpu.matmul %27, %28, %cst_25 {dimension_numbers = #tpu.dot_dimension_numbers<[1], [0], [0], [1], [0, 0, 1, 1], [], []>} : vector<48x128xf32>, vector<128x1xf32>, vector<48x1xf32> -> vector<48x1xf32>
    %c0_26 = arith.constant 0 : index
    %c0_27 = arith.constant 0 : index
    %30 = vector.load %arg9[%c0_26, %c0_27] : memref<1x1xf32, #tpu.memory_space<vmem>>, vector<1x1xf32>
    %31 = vector.broadcast %30 : vector<1x1xf32> to vector<48x1xf32>
    %32 = arith.addf %29, %31 : vector<48x1xf32>
    %cst_28 = arith.constant 0.000000e+00 : f32
    %33 = vector.broadcast %cst_28 : f32 to vector<48x1xf32>
    %34 = arith.cmpf ogt, %32, %33 : vector<48x1xf32>
    %cst_29 = arith.constant 0.00999999977 : f32
    %35 = vector.broadcast %cst_29 : f32 to vector<48x1xf32>
    %36 = arith.mulf %35, %32 : vector<48x1xf32>
    %37 = arith.select %34, %32, %36 : vector<48x1xi1>, vector<48x1xf32>
    %38 = vector.extract_strided_slice %37 {offsets = [0, 0], sizes = [8, 1], strides = [1, 1]} : vector<48x1xf32> to vector<8x1xf32>
    %39 = vector.extract_strided_slice %37 {offsets = [8, 0], sizes = [8, 1], strides = [1, 1]} : vector<48x1xf32> to vector<8x1xf32>
    %40 = vector.extract_strided_slice %37 {offsets = [16, 0], sizes = [8, 1], strides = [1, 1]} : vector<48x1xf32> to vector<8x1xf32>
    %41 = vector.extract_strided_slice %37 {offsets = [24, 0], sizes = [8, 1], strides = [1, 1]} : vector<48x1xf32> to vector<8x1xf32>
    %42 = vector.extract_strided_slice %37 {offsets = [32, 0], sizes = [8, 1], strides = [1, 1]} : vector<48x1xf32> to vector<8x1xf32>
    %43 = vector.extract_strided_slice %37 {offsets = [40, 0], sizes = [8, 1], strides = [1, 1]} : vector<48x1xf32> to vector<8x1xf32>
    %44 = arith.maximumf %38, %39 : vector<8x1xf32>
    %45 = arith.maximumf %44, %40 : vector<8x1xf32>
    %46 = arith.maximumf %45, %41 : vector<8x1xf32>
    %47 = arith.maximumf %46, %42 : vector<8x1xf32>
    %48 = arith.maximumf %47, %43 : vector<8x1xf32>
    %49 = arith.subf %38, %48 : vector<8x1xf32>
    %50 = math.exp %49 : vector<8x1xf32>
    %51 = arith.subf %39, %48 : vector<8x1xf32>
    %52 = math.exp %51 : vector<8x1xf32>
    %53 = arith.subf %40, %48 : vector<8x1xf32>
    %54 = math.exp %53 : vector<8x1xf32>
    %55 = arith.subf %41, %48 : vector<8x1xf32>
    %56 = math.exp %55 : vector<8x1xf32>
    %57 = arith.subf %42, %48 : vector<8x1xf32>
    %58 = math.exp %57 : vector<8x1xf32>
    %59 = arith.subf %43, %48 : vector<8x1xf32>
    %60 = math.exp %59 : vector<8x1xf32>
    %61 = arith.addf %50, %52 : vector<8x1xf32>
    %62 = arith.addf %61, %54 : vector<8x1xf32>
    %63 = arith.addf %62, %56 : vector<8x1xf32>
    %64 = arith.addf %63, %58 : vector<8x1xf32>
    %65 = arith.addf %64, %60 : vector<8x1xf32>
    %66 = arith.divf %50, %65 : vector<8x1xf32>
    %67 = arith.divf %52, %65 : vector<8x1xf32>
    %68 = arith.divf %54, %65 : vector<8x1xf32>
    %69 = arith.divf %56, %65 : vector<8x1xf32>
    %70 = arith.divf %58, %65 : vector<8x1xf32>
    %71 = arith.divf %60, %65 : vector<8x1xf32>
    %72 = vector.broadcast %66 : vector<8x1xf32> to vector<8x128xf32>
    %73 = arith.mulf %72, %2 : vector<8x128xf32>
    %74 = vector.broadcast %67 : vector<8x1xf32> to vector<8x128xf32>
    %75 = arith.mulf %74, %4 : vector<8x128xf32>
    %76 = arith.addf %73, %75 : vector<8x128xf32>
    %77 = vector.broadcast %68 : vector<8x1xf32> to vector<8x128xf32>
    %78 = arith.mulf %77, %6 : vector<8x128xf32>
    %79 = arith.addf %76, %78 : vector<8x128xf32>
    %80 = vector.broadcast %69 : vector<8x1xf32> to vector<8x128xf32>
    %81 = arith.mulf %80, %8 : vector<8x128xf32>
    %82 = arith.addf %79, %81 : vector<8x128xf32>
    %83 = vector.broadcast %70 : vector<8x1xf32> to vector<8x128xf32>
    %84 = arith.mulf %83, %10 : vector<8x128xf32>
    %85 = arith.addf %82, %84 : vector<8x128xf32>
    %86 = vector.broadcast %71 : vector<8x1xf32> to vector<8x128xf32>
    %87 = arith.mulf %86, %12 : vector<8x128xf32>
    %88 = arith.addf %85, %87 : vector<8x128xf32>
    %c0_30 = arith.constant 0 : index
    %c0_31 = arith.constant 0 : index
    %89 = vector.load %arg4[%c0_30, %c0_31] : memref<8x128xf32, #tpu.memory_space<vmem>>, vector<8x128xf32>
    %c0_32 = arith.constant 0 : index
    %c0_33 = arith.constant 0 : index
    %90 = vector.load %arg10[%c0_32, %c0_33] : memref<128x64xf32, #tpu.memory_space<vmem>>, vector<128x64xf32>
    %cst_34 = arith.constant dense<0.000000e+00> : vector<8x64xf32>
    %91 = tpu.matmul %89, %90, %cst_34 {dimension_numbers = #tpu.dot_dimension_numbers<[1], [0], [0], [1], [0, 0, 1, 1], [], []>} : vector<8x128xf32>, vector<128x64xf32>, vector<8x64xf32> -> vector<8x64xf32>
    %c0_35 = arith.constant 0 : index
    %c0_36 = arith.constant 0 : index
    %92 = vector.load %arg11[%c0_35, %c0_36] : memref<128x64xf32, #tpu.memory_space<vmem>>, vector<128x64xf32>
    %cst_37 = arith.constant dense<0.000000e+00> : vector<8x64xf32>
    %93 = tpu.matmul %88, %92, %cst_37 {dimension_numbers = #tpu.dot_dimension_numbers<[1], [0], [0], [1], [0, 0, 1, 1], [], []>} : vector<8x128xf32>, vector<128x64xf32>, vector<8x64xf32> -> vector<8x64xf32>
    %94 = arith.addf %91, %93 : vector<8x64xf32>
    %c0_38 = arith.constant 0 : index
    %c0_39 = arith.constant 0 : index
    %95 = vector.load %arg12[%c0_38, %c0_39] : memref<1x64xf32, #tpu.memory_space<vmem>>, vector<1x64xf32>
    %96 = vector.broadcast %95 : vector<1x64xf32> to vector<8x64xf32>
    %97 = arith.addf %94, %96 : vector<8x64xf32>
    %cst_40 = arith.constant 0.000000e+00 : f32
    %98 = vector.broadcast %cst_40 : f32 to vector<8x64xf32>
    %99 = arith.cmpf ogt, %97, %98 : vector<8x64xf32>
    %cst_41 = arith.constant 0.00999999977 : f32
    %100 = vector.broadcast %cst_41 : f32 to vector<8x64xf32>
    %101 = arith.mulf %100, %97 : vector<8x64xf32>
    %102 = arith.select %99, %97, %101 : vector<8x64xi1>, vector<8x64xf32>
    %c0_42 = arith.constant 0 : index
    %c0_43 = arith.constant 0 : index
    %103 = vector.load %arg13[%c0_42, %c0_43] : memref<64x512xf32, #tpu.memory_space<vmem>>, vector<64x512xf32>
    %cst_44 = arith.constant dense<0.000000e+00> : vector<8x512xf32>
    %104 = tpu.matmul %102, %103, %cst_44 {dimension_numbers = #tpu.dot_dimension_numbers<[1], [0], [0], [1], [0, 0, 1, 1], [], []>} : vector<8x64xf32>, vector<64x512xf32>, vector<8x512xf32> -> vector<8x512xf32>
    %c0_45 = arith.constant 0 : index
    %c0_46 = arith.constant 0 : index
    %105 = vector.load %arg14[%c0_45, %c0_46] : memref<128x512xf32, #tpu.memory_space<vmem>>, vector<128x512xf32>
    %cst_47 = arith.constant dense<0.000000e+00> : vector<8x512xf32>
    %106 = tpu.matmul %0, %105, %cst_47 {dimension_numbers = #tpu.dot_dimension_numbers<[1], [0], [0], [1], [0, 0, 1, 1], [], []>} : vector<8x128xf32>, vector<128x512xf32>, vector<8x512xf32> -> vector<8x512xf32>
    %107 = arith.addf %104, %106 : vector<8x512xf32>
    %c0_48 = arith.constant 0 : index
    %c0_49 = arith.constant 0 : index
    %108 = vector.load %arg15[%c0_48, %c0_49] : memref<1x512xf32, #tpu.memory_space<vmem>>, vector<1x512xf32>
    %109 = vector.broadcast %108 : vector<1x512xf32> to vector<8x512xf32>
    %110 = arith.addf %107, %109 : vector<8x512xf32>
    %111 = vector.extract_strided_slice %110 {offsets = [0, 0], sizes = [8, 128], strides = [1, 1]} : vector<8x512xf32> to vector<8x128xf32>
    %cst_50 = arith.constant 0.000000e+00 : f32
    %112 = vector.broadcast %cst_50 : f32 to vector<8x128xf32>
    %113 = arith.subf %112, %111 : vector<8x128xf32>
    %114 = math.exp %113 : vector<8x128xf32>
    %cst_51 = arith.constant 1.000000e+00 : f32
    %115 = vector.broadcast %cst_51 : f32 to vector<8x128xf32>
    %116 = arith.addf %115, %114 : vector<8x128xf32>
    %cst_52 = arith.constant 1.000000e+00 : f32
    %117 = vector.broadcast %cst_52 : f32 to vector<8x128xf32>
    %118 = arith.divf %117, %116 : vector<8x128xf32>
    %119 = vector.extract_strided_slice %110 {offsets = [0, 128], sizes = [8, 128], strides = [1, 1]} : vector<8x512xf32> to vector<8x128xf32>
    %cst_53 = arith.constant 0.000000e+00 : f32
    %120 = vector.broadcast %cst_53 : f32 to vector<8x128xf32>
    %121 = arith.subf %120, %119 : vector<8x128xf32>
    %122 = math.exp %121 : vector<8x128xf32>
    %cst_54 = arith.constant 1.000000e+00 : f32
    %123 = vector.broadcast %cst_54 : f32 to vector<8x128xf32>
    %124 = arith.addf %123, %122 : vector<8x128xf32>
    %cst_55 = arith.constant 1.000000e+00 : f32
    %125 = vector.broadcast %cst_55 : f32 to vector<8x128xf32>
    %126 = arith.divf %125, %124 : vector<8x128xf32>
    %127 = vector.extract_strided_slice %110 {offsets = [0, 256], sizes = [8, 128], strides = [1, 1]} : vector<8x512xf32> to vector<8x128xf32>
    %128 = math.tanh %127 : vector<8x128xf32>
    %129 = vector.extract_strided_slice %110 {offsets = [0, 384], sizes = [8, 128], strides = [1, 1]} : vector<8x512xf32> to vector<8x128xf32>
    %cst_56 = arith.constant 0.000000e+00 : f32
    %130 = vector.broadcast %cst_56 : f32 to vector<8x128xf32>
    %131 = arith.subf %130, %129 : vector<8x128xf32>
    %132 = math.exp %131 : vector<8x128xf32>
    %cst_57 = arith.constant 1.000000e+00 : f32
    %133 = vector.broadcast %cst_57 : f32 to vector<8x128xf32>
    %134 = arith.addf %133, %132 : vector<8x128xf32>
    %cst_58 = arith.constant 1.000000e+00 : f32
    %135 = vector.broadcast %cst_58 : f32 to vector<8x128xf32>
    %136 = arith.divf %135, %134 : vector<8x128xf32>
    %c0_59 = arith.constant 0 : index
    %c0_60 = arith.constant 0 : index
    %137 = vector.load %arg3[%c0_59, %c0_60] : memref<8x128xf32, #tpu.memory_space<vmem>>, vector<8x128xf32>
    %138 = arith.mulf %126, %137 : vector<8x128xf32>
    %139 = arith.mulf %118, %128 : vector<8x128xf32>
    %140 = arith.addf %138, %139 : vector<8x128xf32>
    %141 = math.tanh %140 : vector<8x128xf32>
    %142 = arith.mulf %136, %141 : vector<8x128xf32>
    %143 = tpu.iota {dimensions = array<i32: 1>} : vector<8x6xi32>
    %cst_61 = arith.constant 0.000000e+00 : f32
    %144 = vector.broadcast %cst_61 : f32 to vector<8x6xf32>
    %c0_i32 = arith.constant 0 : i32
    %145 = vector.broadcast %c0_i32 : i32 to vector<8x6xi32>
    %146 = arith.cmpi eq, %143, %145 : vector<8x6xi32>
    %147 = vector.shape_cast %66 : vector<8x1xf32> to vector<8x1xf32>
    %148 = vector.broadcast %147 : vector<8x1xf32> to vector<8x6xf32>
    %149 = arith.select %146, %148, %144 : vector<8x6xi1>, vector<8x6xf32>
    %c1_i32 = arith.constant 1 : i32
    %150 = vector.broadcast %c1_i32 : i32 to vector<8x6xi32>
    %151 = arith.cmpi eq, %143, %150 : vector<8x6xi32>
    %152 = vector.shape_cast %67 : vector<8x1xf32> to vector<8x1xf32>
    %153 = vector.broadcast %152 : vector<8x1xf32> to vector<8x6xf32>
    %154 = arith.select %151, %153, %149 : vector<8x6xi1>, vector<8x6xf32>
    %c2_i32 = arith.constant 2 : i32
    %155 = vector.broadcast %c2_i32 : i32 to vector<8x6xi32>
    %156 = arith.cmpi eq, %143, %155 : vector<8x6xi32>
    %157 = vector.shape_cast %68 : vector<8x1xf32> to vector<8x1xf32>
    %158 = vector.broadcast %157 : vector<8x1xf32> to vector<8x6xf32>
    %159 = arith.select %156, %158, %154 : vector<8x6xi1>, vector<8x6xf32>
    %c3_i32 = arith.constant 3 : i32
    %160 = vector.broadcast %c3_i32 : i32 to vector<8x6xi32>
    %161 = arith.cmpi eq, %143, %160 : vector<8x6xi32>
    %162 = vector.shape_cast %69 : vector<8x1xf32> to vector<8x1xf32>
    %163 = vector.broadcast %162 : vector<8x1xf32> to vector<8x6xf32>
    %164 = arith.select %161, %163, %159 : vector<8x6xi1>, vector<8x6xf32>
    %c4_i32 = arith.constant 4 : i32
    %165 = vector.broadcast %c4_i32 : i32 to vector<8x6xi32>
    %166 = arith.cmpi eq, %143, %165 : vector<8x6xi32>
    %167 = vector.shape_cast %70 : vector<8x1xf32> to vector<8x1xf32>
    %168 = vector.broadcast %167 : vector<8x1xf32> to vector<8x6xf32>
    %169 = arith.select %166, %168, %164 : vector<8x6xi1>, vector<8x6xf32>
    %c5_i32 = arith.constant 5 : i32
    %170 = vector.broadcast %c5_i32 : i32 to vector<8x6xi32>
    %171 = arith.cmpi eq, %143, %170 : vector<8x6xi32>
    %172 = vector.shape_cast %71 : vector<8x1xf32> to vector<8x1xf32>
    %173 = vector.broadcast %172 : vector<8x1xf32> to vector<8x6xf32>
    %174 = arith.select %171, %173, %169 : vector<8x6xi1>, vector<8x6xf32>
    %c0_62 = arith.constant 0 : index
    %c0_63 = arith.constant 0 : index
    %175 = vector.load %arg16[%c0_62, %c0_63] : memref<8x6xf32, #tpu.memory_space<vmem>>, vector<8x6xf32>
    tpu.vector_store %arg16[%c0_62, %c0_63], %174 {strides = array<i32>} : memref<8x6xf32, #tpu.memory_space<vmem>>, vector<8x6xf32>,
    %c0_64 = arith.constant 0 : index
    %c0_65 = arith.constant 0 : index
    %176 = vector.load %arg17[%c0_64, %c0_65] : memref<8x128xf32, #tpu.memory_space<vmem>>, vector<8x128xf32>
    tpu.vector_store %arg17[%c0_64, %c0_65], %142 {strides = array<i32>} : memref<8x128xf32, #tpu.memory_space<vmem>>, vector<8x128xf32>,
    %c0_66 = arith.constant 0 : index
    %c0_67 = arith.constant 0 : index
    %177 = vector.load %arg18[%c0_66, %c0_67] : memref<8x128xf32, #tpu.memory_space<vmem>>, vector<8x128xf32>
    tpu.vector_store %arg18[%c0_66, %c0_67], %140 {strides = array<i32>} : memref<8x128xf32, #tpu.memory_space<vmem>>, vector<8x128xf32>,
    return
  }
  func.func @transform_0(%arg0: i32) -> (i32, i32, i32) {
    %c0_i32 = arith.constant 0 : i32
    %c0_i32_0 = arith.constant 0 : i32
    %c0_i32_1 = arith.constant 0 : i32
    return %c0_i32, %arg0, %c0_i32_0 : i32, i32, i32
  }
  func.func @transform_1(%arg0: i32) -> (i32, i32) {
    %c0_i32 = arith.constant 0 : i32
    %c0_i32_0 = arith.constant 0 : i32
    return %arg0, %c0_i32 : i32, i32
  }
  func.func @transform_2(%arg0: i32) -> (i32, i32) {
    %c0_i32 = arith.constant 0 : i32
    %c0_i32_0 = arith.constant 0 : i32
    return %arg0, %c0_i32 : i32, i32
  }
  func.func @transform_3(%arg0: i32) -> (i32, i32) {
    %c0_i32 = arith.constant 0 : i32
    %c0_i32_0 = arith.constant 0 : i32
    return %arg0, %c0_i32 : i32, i32
  }
  func.func @transform_4(%arg0: i32) -> (i32, i32) {
    %c0_i32 = arith.constant 0 : i32
    %c0_i32_0 = arith.constant 0 : i32
    %c0_i32_1 = arith.constant 0 : i32
    return %c0_i32, %c0_i32_0 : i32, i32
  }
  func.func @transform_5(%arg0: i32) -> (i32, i32) {
    %c0_i32 = arith.constant 0 : i32
    %c0_i32_0 = arith.constant 0 : i32
    %c0_i32_1 = arith.constant 0 : i32
    return %c0_i32, %c0_i32_0 : i32, i32
  }
  func.func @transform_6(%arg0: i32) -> (i32, i32) {
    %c0_i32 = arith.constant 0 : i32
    %c0_i32_0 = arith.constant 0 : i32
    %c0_i32_1 = arith.constant 0 : i32
    return %c0_i32, %c0_i32_0 : i32, i32
  }
  func.func @transform_7(%arg0: i32) -> (i32, i32) {
    %c0_i32 = arith.constant 0 : i32
    %c0_i32_0 = arith.constant 0 : i32
    %c0_i32_1 = arith.constant 0 : i32
    return %c0_i32, %c0_i32_0 : i32, i32
  }
  func.func @transform_8(%arg0: i32) -> (i32, i32) {
    %c0_i32 = arith.constant 0 : i32
    %c0_i32_0 = arith.constant 0 : i32
    %c0_i32_1 = arith.constant 0 : i32
    return %c0_i32, %c0_i32_0 : i32, i32
  }
  func.func @transform_9(%arg0: i32) -> (i32, i32) {
    %c0_i32 = arith.constant 0 : i32
    %c0_i32_0 = arith.constant 0 : i32
    %c0_i32_1 = arith.constant 0 : i32
    return %c0_i32, %c0_i32_0 : i32, i32
  }
  func.func @transform_10(%arg0: i32) -> (i32, i32) {
    %c0_i32 = arith.constant 0 : i32
    %c0_i32_0 = arith.constant 0 : i32
    %c0_i32_1 = arith.constant 0 : i32
    return %c0_i32, %c0_i32_0 : i32, i32
  }
  func.func @transform_11(%arg0: i32) -> (i32, i32) {
    %c0_i32 = arith.constant 0 : i32
    %c0_i32_0 = arith.constant 0 : i32
    %c0_i32_1 = arith.constant 0 : i32
    return %c0_i32, %c0_i32_0 : i32, i32
  }
  func.func @transform_12(%arg0: i32) -> (i32, i32) {
    %c0_i32 = arith.constant 0 : i32
    %c0_i32_0 = arith.constant 0 : i32
    %c0_i32_1 = arith.constant 0 : i32
    return %c0_i32, %c0_i32_0 : i32, i32
  }
  func.func @transform_13(%arg0: i32) -> (i32, i32) {
    %c0_i32 = arith.constant 0 : i32
    %c0_i32_0 = arith.constant 0 : i32
    %c0_i32_1 = arith.constant 0 : i32
    return %c0_i32, %c0_i32_0 : i32, i32
  }
  func.func @transform_14(%arg0: i32) -> (i32, i32) {
    %c0_i32 = arith.constant 0 : i32
    %c0_i32_0 = arith.constant 0 : i32
    %c0_i32_1 = arith.constant 0 : i32
    return %c0_i32, %c0_i32_0 : i32, i32
  }
  func.func @transform_15(%arg0: i32) -> (i32, i32) {
    %c0_i32 = arith.constant 0 : i32
    %c0_i32_0 = arith.constant 0 : i32
    return %arg0, %c0_i32 : i32, i32
  }
  func.func @transform_16(%arg0: i32) -> (i32, i32) {
    %c0_i32 = arith.constant 0 : i32
    %c0_i32_0 = arith.constant 0 : i32
    return %arg0, %c0_i32 : i32, i32
  }
  func.func @transform_17(%arg0: i32) -> (i32, i32) {
    %c0_i32 = arith.constant 0 : i32
    %c0_i32_0 = arith.constant 0 : i32
    return %arg0, %c0_i32 : i32, i32
  }
}

</mosaic_0001>

<bundles_post_ra>
// kernel: tpu_custom_call.1
= control target key start
LH: loop header
LB: loop body
LE: loop exit
PB: predicated region body
PF: predicated region fallthrough
CT: control target
= control target key end

     0   :  { %s2716_s0 = inlined_call_operand.vmem [shape: f32[6,8,128], index: 0, kind: input, shape index: {}]   ;;  %s2717_s1 = inlined_call_operand.hbm [shape: f32[8,128], index: 1, kind: input, shape index: {}]   ;;  %s2718_s2 = inlined_call_operand.hbm [shape: f32[8,128], index: 2, kind: input, shape index: {}]   ;;  %s2719_s3 = inlined_call_operand.hbm [shape: f32[8,128], index: 3, kind: input, shape index: {}]   ;;  %s2720_s4 = inlined_call_operand.hbm [shape: f32[128,128], index: 4, kind: input, shape index: {}]   ;;  %s2721_s5 = inlined_call_operand.hbm [shape: f32[128,128], index: 5, kind: input, shape index: {}]   ;;  %s2722_s6 = inlined_call_operand.vmem [shape: f32[1,128], index: 6, kind: input, shape index: {}]   ;;  %s2723_s7 = inlined_call_operand.vmem [shape: f32[128,1], index: 7, kind: input, shape index: {}]   ;;  %s2724_s8 = inlined_call_operand.<no memory space> [shape: f32[1,1], index: 8, kind: input, shape index: {}]   ;;  %s2725_s9 = inlined_call_operand.vmem [shape: f32[128,64], index: 9, kind: input, shape index: {}]   ;;  %s2726_s10 = inlined_call_operand.vmem [shape: f32[128,64], index: 10, kind: input, shape index: {}]   ;;  %s2727_s11 = inlined_call_operand.vmem [shape: f32[1,64], index: 11, kind: input, shape index: {}]   ;;  %s2728_s12 = inlined_call_operand.hbm [shape: f32[64,512], index: 12, kind: input, shape index: {}]   ;;  %s2729_s13 = inlined_call_operand.vmem [shape: f32[128,512], index: 13, kind: input, shape index: {}]   ;;  %s2730_s14 = inlined_call_operand.vmem [shape: f32[1,512], index: 14, kind: input, shape index: {}]   ;;  %s2731_s15 = inlined_call_operand.hbm [shape: f32[8,6], index: 15, kind: output, shape index: {0}]   ;;  %s2732_s16 = inlined_call_operand.hbm [shape: f32[8,128], index: 16, kind: output, shape index: {1}]   ;;  %s2733_s17 = inlined_call_operand.hbm [shape: f32[8,128], index: 17, kind: output, shape index: {2}]  }
   0x1   :  { %2736 = sst [smem:[#allocation24_spill]] %s2716_s0  ;;  %v23_v0 = vstv %s2724_s8 }
   0x2   :  { %2737 = sst [smem:[#allocation25_spill]] %s2717_s1  ;;  %24 = vst [vmem:[#allocation2] sm:$0x1] %v23_v0 }
   0x3   :  { %25 = vsyncpa [#allocation4], 0 }
   0x4   :  { %26 = vsyncpa [#allocation7], 0 }
   0x5   :  { %27 = vsyncpa [#allocation10], 0 }
   0x6   :  { %28 = vsyncpa [#allocation13], 0 }
   0x7   :  { %29 = vsyncpa [#allocation5], 0 }
   0x8   :  { %30 = vsyncpa [#allocation16], 0  ;;  %s2048_s26 = smov [#allocation6]   ;;  %s2049_s28 = smov [#allocation9]  }
   0x9   :  { %s49_s27 = sshll.u32 %s2048_s26, 4  ;;  %s68_s29 = sshll.u32 %s2049_s28, 4  ;;  %s50_s27 = int_to_ptr.vmem [resolvable:$true] %s49_s27  ;;  %s2158_s29 = int_to_ptr.vmem [resolvable:$true] %s68_s29 }
   0xa   :  { %s1838_s18 = scalar_lea.hbm %s2718_s2, 128 }
   0xb   :  { %p1839_p0 = scmp.ne.s32.totalorder %s2718_s2, %s1838_s18  ;;  %p1842_p1 = scmp.lt.u32.totalorder %s1838_s18, %s2718_s2 }
   0xd   :  { %p1844_p2 = pnand %p1842_p1, %p1839_p0 }
   0xf   :  { %1847 = shalt.err (!%p1844_p2)
}
  0x10   :  { %s1848_s21 = scalar_lea.vmem %s50_s27, 128  ;;  %p1853_p4 = scmp.lt.s32.totalorder %s50_s27, %s50_s27 }
  0x11   :  { %p1849_p3 = scmp.ne.s32.totalorder %s50_s27, %s1848_s21  ;;  %p1854_p5 = scmp.lt.s32.totalorder %s1848_s21, %s1848_s21 }
  0x13   :  { %p1855_p6 = por %p1854_p5, %p1853_p4 }
  0x15   :  { %p1856_p7 = pnand %p1855_p6, %p1849_p3 }
  0x17   :  { %1859 = shalt.err (!%p1856_p7)
}
  0x18   :  { %52 = dma.hbm_to_vmem [thread:$0]  %s2718_s2, 128, %s50_s27, [#allocation7]  }
  0x19   :  { %s1860_s26 = scalar_lea.hbm %s2720_s4, 2048 }
  0x1a   :  { %p1861_p8 = scmp.ne.s32.totalorder %s2720_s4, %s1860_s26  ;;  %p1864_p9 = scmp.lt.u32.totalorder %s1860_s26, %s2720_s4 }
  0x1c   :  { %p1866_p10 = pnand %p1864_p9, %p1861_p8 }
  0x1e   :  { %1869 = shalt.err (!%p1866_p10)
}
  0x1f   :  { %s1870_s19 = scalar_lea.vmem %s2158_s29, 2048  ;;  %p1875_p12 = scmp.lt.s32.totalorder %s2158_s29, %s2158_s29 }
  0x20   :  { %p1871_p11 = scmp.ne.s32.totalorder %s2158_s29, %s1870_s19  ;;  %p1876_p13 = scmp.lt.s32.totalorder %s1870_s19, %s1870_s19 }
  0x22   :  { %p1877_p0 = por %p1876_p13, %p1875_p12 }
  0x24   :  { %p1878_p1 = pnand %p1877_p0, %p1871_p11 }
  0x26   :  { %1881 = shalt.err (!%p1878_p1)
}
  0x27   :  { %s2050_s2 = smov 128   ;;  %s2051_s27 = smov 8  }
  0x28   :  { %74 = dma.hbm_to_vmem [thread:$0]  %s2720_s4, 2048, %s2158_s29, [#allocation10], %s2050_s2, %s2050_s2, %s2051_s27  }
  0x29   :  { %s2052_s20 = smov [#allocation3]   ;;  %s2053_s22 = smov [#allocation8]  }
  0x2a   :  { %s39_s21 = sshll.u32 %s2052_s20, 4  ;;  %s59_s23 = sshll.u32 %s2053_s22, 4  ;;  %s40_s21 = int_to_ptr.vmem [resolvable:$true] %s39_s21  ;;  %s60_s23 = int_to_ptr.vmem [resolvable:$true] %s59_s23 }
  0x2b   :  { %s2738_s26 = sld [smem:[#allocation25_spill]] }
  0x31   :  { %s1882_s28 = scalar_lea.hbm %s2738_s26, 128 }
  0x32   :  { %p1883_p2 = scmp.ne.s32.totalorder %s2738_s26, %s1882_s28  ;;  %p1886_p3 = scmp.lt.u32.totalorder %s1882_s28, %s2738_s26 }
  0x34   :  { %p1888_p4 = pnand %p1886_p3, %p1883_p2 }
  0x36   :  { %1891 = shalt.err (!%p1888_p4)
}
  0x37   :  { %s1892_s4 = scalar_lea.vmem %s40_s21, 128  ;;  %p1897_p6 = scmp.lt.s32.totalorder %s40_s21, %s40_s21 }
  0x38   :  { %p1893_p5 = scmp.ne.s32.totalorder %s40_s21, %s1892_s4  ;;  %p1898_p7 = scmp.lt.s32.totalorder %s1892_s4, %s1892_s4 }
  0x3a   :  { %p1899_p8 = por %p1898_p7, %p1897_p6 }
  0x3c   :  { %p1900_p9 = pnand %p1899_p8, %p1893_p5 }
  0x3e   :  { %1903 = shalt.err (!%p1900_p9)
}
  0x3f   :  { %42 = dma.hbm_to_vmem [thread:$0]  %s2738_s26, 128, %s40_s21, [#allocation4]  }
  0x40   :  { %s1904_s22 = scalar_lea.hbm %s2719_s3, 128 }
  0x41   :  { %p1905_p10 = scmp.ne.s32.totalorder %s2719_s3, %s1904_s22  ;;  %p1908_p11 = scmp.lt.u32.totalorder %s1904_s22, %s2719_s3 }
  0x43   :  { %p1910_p12 = pnand %p1908_p11, %p1905_p10 }
  0x45   :  { %1913 = shalt.err (!%p1910_p12)
}
  0x46   :  { %s1914_s30 = scalar_lea.vmem %s60_s23, 128  ;;  %p1919_p0 = scmp.lt.s32.totalorder %s60_s23, %s60_s23 }
  0x47   :  { %p1915_p13 = scmp.ne.s32.totalorder %s60_s23, %s1914_s30  ;;  %p1920_p1 = scmp.lt.s32.totalorder %s1914_s30, %s1914_s30 }
  0x49   :  { %p1921_p2 = por %p1920_p1, %p1919_p0 }
  0x4b   :  { %p1922_p3 = pnand %p1921_p2, %p1915_p13 }
  0x4d   :  { %1925 = shalt.err (!%p1922_p3)
}
  0x4e   :  { %62 = dma.hbm_to_vmem [thread:$0]  %s2719_s3, 128, %s60_s23, [#allocation7]  }
  0x4f   :  { %s2054_s18 = smov [#allocation11]   ;;  %s2055_s4 = smov [#allocation12]  }
  0x50   :  { %s80_s19 = sshll.u32 %s2054_s18, 4  ;;  %s104_s29 = sshll.u32 %s2055_s4, 4  ;;  %s81_s19 = int_to_ptr.vmem [resolvable:$true] %s80_s19  ;;  %s2216_s29 = int_to_ptr.vmem [resolvable:$true] %s104_s29 }
  0x51   :  { %s1926_s20 = scalar_lea.hbm %s2721_s5, 2048 }
  0x52   :  { %p1927_p4 = scmp.ne.s32.totalorder %s2721_s5, %s1926_s20  ;;  %p1930_p5 = scmp.lt.u32.totalorder %s1926_s20, %s2721_s5 }
  0x54   :  { %p1932_p6 = pnand %p1930_p5, %p1927_p4 }
  0x56   :  { %1935 = shalt.err (!%p1932_p6)
}
  0x57   :  { %s1936_s3 = scalar_lea.vmem %s81_s19, 2048  ;;  %p1941_p8 = scmp.lt.s32.totalorder %s81_s19, %s81_s19 }
  0x58   :  { %p1937_p7 = scmp.ne.s32.totalorder %s81_s19, %s1936_s3  ;;  %p1942_p9 = scmp.lt.s32.totalorder %s1936_s3, %s1936_s3 }
  0x5a   :  { %p1943_p10 = por %p1942_p9, %p1941_p8 }
  0x5c   :  { %p1944_p11 = pnand %p1943_p10, %p1937_p7 }
  0x5e   :  { %1947 = shalt.err (!%p1944_p11)
}
  0x5f   :  { %86 = dma.hbm_to_vmem [thread:$0]  %s2721_s5, 2048, %s81_s19, [#allocation10], %s2050_s2, %s2050_s2, %s2051_s27  }
  0x60   :  { %s1948_s26 = scalar_lea.hbm %s2728_s12, 4096 }
  0x61   :  { %p1949_p12 = scmp.ne.s32.totalorder %s2728_s12, %s1948_s26  ;;  %p1952_p13 = scmp.lt.u32.totalorder %s1948_s26, %s2728_s12 }
  0x63   :  { %p1954_p0 = pnand %p1952_p13, %p1949_p12 }
  0x65   :  { %1957 = shalt.err (!%p1954_p0)
}
  0x66   :  { %s1958_s20 = scalar_lea.vmem %s2216_s29, 4096  ;;  %p1963_p2 = scmp.lt.s32.totalorder %s2216_s29, %s2216_s29 }
  0x67   :  { %p1959_p1 = scmp.ne.s32.totalorder %s2216_s29, %s1958_s20  ;;  %p1964_p3 = scmp.lt.s32.totalorder %s1958_s20, %s1958_s20 }
  0x69   :  { %p1965_p4 = por %p1964_p3, %p1963_p2 }
  0x6b   :  { %p1966_p5 = pnand %p1965_p4, %p1959_p1 }
  0x6d   :  { %1969 = shalt.err (!%p1966_p5)
}
  0x6e   :  { %s2056_s5 = smov 512   ;;  %s2057_s2 = smov 32  }
  0x6f   :  { %110 = dma.hbm_to_vmem [thread:$0]  %s2728_s12, 4096, %s2216_s29, [#allocation13], %s2056_s5, %s2056_s5, %s2057_s2  }
  0x70   :  { %2036 = dma.done.wait [#allocation4], 128  }
  0x71   :  { %2037 = vsyncadd [#allocation4], 4294967168 }
  0x72   :  { %2038 = dma.done.wait [#allocation7], 256  }
  0x73   :  { %2039 = vsyncadd [#allocation7], 4294967040 }
  0x74   :  { %2040 = dma.done.wait [#allocation10], 4096  }
  0x75   :  { %2041 = vsyncadd [#allocation10], 4294963200 }
  0x76   :  { %2042 = dma.done.wait [#allocation13], 4096  }
  0x77   :  { %2043 = vsyncadd [#allocation13], 4294963200  ;;  %v2058_v1 = vmov 0.0|0.0   ;;  %vm2059_vm0 = vmmov 0   ;;  %v2060_v2 = vmov 0.0   ;;  %v145_v3 = vld [vmem:[#allocation11] sm:$0xff] }
  0x78   :  { %1553 = vmatprep.subr.bf16.mxu0 %v2058_v1  ;;  %1398 = vmatprep.mubr.msk.f32.mxu0 %vm2059_vm0, %v2060_v2  ;;  %v146_v4 = vld [vmem:[#allocation11 + $0x8] sm:$0xff]  ;;  %v238_v5 = vld [vmem:[#allocation9] sm:$0xff]  ;;  %v147_v8 = vld [vmem:[#allocation11 + $0x10] sm:$0xff]  ;;  %s2739_s22 = sld [smem:[#allocation24_spill]] }
  0x79   :  { %v1554_v6 = vpack.c.bf16 %v146_v4, %v145_v3  ;;  %v239_v7 = vld [vmem:[#allocation9 + $0x8] sm:$0xff]  ;;  %v148_v9 = vld [vmem:[#allocation11 + $0x18] sm:$0xff]  ;;  %v240_v11 = vld [vmem:[#allocation9 + $0x10] sm:$0xff] }
  0x7a   :  { %v1577_v10 = vpack.c.bf16 %v239_v7, %v238_v5  ;;  %v241_v12 = vld [vmem:[#allocation9 + $0x18] sm:$0xff]  ;;  %v1557_v13 = vpack.c.bf16 %v148_v9, %v147_v8  ;;  %v242_v15 = vld [vmem:[#allocation9 + $0x20] sm:$0xff]  ;;  %v243_v16 = vld [vmem:[#allocation9 + $0x28] sm:$0xff] }
  0x7b   :  { %1555 = vmatpush3.bf16.msra.mxu0 %v1554_v6  ;;  %v1581_v14 = vpack.c.bf16 %v241_v12, %v240_v11  ;;  %v149_v17 = vld [vmem:[#allocation11 + $0x20] sm:$0xff]  ;;  %v150_v18 = vld [vmem:[#allocation11 + $0x28] sm:$0xff]  ;;  %v1585_v19 = vpack.c.bf16 %v243_v16, %v242_v15  ;;  %v244_v21 = vld [vmem:[#allocation9 + $0x30] sm:$0xff] }
  0x7c   :  { %1578 = vmatprep.subr.bf16.mxu1 %v1577_v10  ;;  %1556 = vmatprep.subr.bf16.mxu0 %v2058_v1  ;;  %v1560_v20 = vpack.c.bf16 %v150_v18, %v149_v17  ;;  %v245_v22 = vld [vmem:[#allocation9 + $0x38] sm:$0xff]  ;;  %v151_v23 = vld [vmem:[#allocation11 + $0x30] sm:$0xff]  ;;  %v246_v27 = vld [vmem:[#allocation9 + $0x40] sm:$0xff] }
  0x7d   :  { %1580 = vmatpush3.bf16.msra.mxu1 %v1577_v10  ;;  %v152_v24 = vld [vmem:[#allocation11 + $0x38] sm:$0xff]  ;;  %v1589_v25 = vpack.c.bf16 %v245_v22, %v244_v21  ;;  %v247_v28 = vld [vmem:[#allocation9 + $0x48] sm:$0xff]  ;;  %v153_v30 = vld [vmem:[#allocation11 + $0x40] sm:$0xff] }
  0x7e   :  { %1582 = vmatprep.subr.bf16.mxu1 %v1581_v14  ;;  %v1563_v26 = vpack.c.bf16 %v152_v24, %v151_v23  ;;  %v2258_v29 = vld [vmem:[%s2739_s22] sm:$0xff]  ;;  %v1593_v32 = vpack.c.bf16 %v247_v28, %v246_v27  ;;  %v248_v34 = vld [vmem:[#allocation9 + $0x50] sm:$0xff]  ;;  %v249_v35 = vld [vmem:[#allocation9 + $0x58] sm:$0xff] }
  0x7f   :  { %1558 = vmatpush3.bf16.msra.mxu0 %v1557_v13  ;;  %v154_v31 = vld [vmem:[#allocation11 + $0x48] sm:$0xff]  ;;  %1433 = vmatprep.mubr.f32.mxu1 %v2258_v29  ;;  %v155_v36 = vld [vmem:[#allocation11 + $0x50] sm:$0xff]  ;;  %v156_v37 = vld [vmem:[#allocation11 + $0x58] sm:$0xff]  ;;  %v1597_v38 = vpack.c.bf16 %v249_v35, %v248_v34 }
  0x80   :  { %1559 = vmatprep.subr.bf16.mxu0 %v2058_v1  ;;  %v1566_v33 = vpack.c.bf16 %v154_v31, %v153_v30  ;;  %v1569_v39 = vpack.c.bf16 %v156_v37, %v155_v36  ;;  %v250_v40 = vld [vmem:[#allocation9 + $0x60] sm:$0xff]  ;;  %v251_v41 = vld [vmem:[#allocation9 + $0x68] sm:$0xff]  ;;  %v252_v46 = vld [vmem:[#allocation9 + $0x70] sm:$0xff] }
  0x81   :  { %1584 = vmatpush3.bf16.msra.mxu1 %v1581_v14  ;;  %v157_v42 = vld [vmem:[#allocation11 + $0x60] sm:$0xff]  ;;  %v158_v43 = vld [vmem:[#allocation11 + $0x68] sm:$0xff]  ;;  %v1601_v44 = vpack.c.bf16 %v251_v41, %v250_v40  ;;  %v253_v47 = vld [vmem:[#allocation9 + $0x78] sm:$0xff] }
  0x82   :  { %1586 = vmatprep.subr.bf16.mxu1 %v1585_v19  ;;  %v1572_v45 = vpack.c.bf16 %v158_v43, %v157_v42  ;;  %v159_v48 = vld [vmem:[#allocation11 + $0x70] sm:$0xff]  ;;  %v160_v49 = vld [vmem:[#allocation11 + $0x78] sm:$0xff]  ;;  %v367_v50 = vld [vmem:[%s2723_s7] sm:$0xff]  ;;  %v1605_v52 = vpack.c.bf16 %v253_v47, %v252_v46 }
  0x83   :  { %1561 = vmatpush3.bf16.msra.mxu0 %v1560_v20  ;;  %v368_v51 = vld [vmem:[%s2723_s7 + $0x8] sm:$0xff]  ;;  %v1575_v53 = vpack.c.bf16 %v160_v49, %v159_v48  ;;  %v369_v55 = vld [vmem:[%s2723_s7 + $0x10] sm:$0xff]  ;;  %v370_v56 = vld [vmem:[%s2723_s7 + $0x18] sm:$0xff]  ;;  %v2061_v49 = vmov 0  }
  0x84   :  { %1562 = vmatprep.subr.bf16.mxu0 %v2058_v1  ;;  %v1609_v54 = vpack.c.bf16 %v368_v51, %v367_v50  ;;  %v2278_v57 = vld [vmem:[#allocation3] sm:$0xff]  ;;  %v1613_v58 = vpack.c.bf16 %v370_v56, %v369_v55  ;;  %v2295_v62 = vld [vmem:[%s2739_s22 + $0x10] sm:$0xff]  ;;  %v2303_v0 = vld [vmem:[%s2739_s22 + $0x18] sm:$0xff]  ;;  %1807 = vset.pattern.permute.xlu1 %v2061_v49 }
  0x85   :  { %1588 = vmatpush3.bf16.msra.mxu1 %v1585_v19  ;;  %v2283_v59 = vld [vmem:[%s2739_s22 + $0x8] sm:$0xff]  ;;  %v371_v60 = vld [vmem:[%s2723_s7 + $0x20] sm:$0xff]  ;;  %v373_v3 = vld [vmem:[%s2723_s7 + $0x30] sm:$0xff]  ;;  %1806 = vset.pattern.permute.xlu0 %v2061_v49 }
  0x86   :  { %1590 = vmatprep.subr.bf16.mxu1 %v1589_v25  ;;  %v372_v61 = vld [vmem:[%s2723_s7 + $0x28] sm:$0xff]  ;;  %v374_v4 = vld [vmem:[%s2723_s7 + $0x38] sm:$0xff]  ;;  %v2314_v5 = vld [vmem:[%s2739_s22 + $0x20] sm:$0xff] }
  0x87   :  { %1564 = vmatpush3.bf16.msra.mxu0 %v1563_v26  ;;  %v1617_v63 = vpack.c.bf16 %v372_v61, %v371_v60  ;;  %v1621_v6 = vpack.c.bf16 %v374_v4, %v373_v3  ;;  %v2321_v7 = vld [vmem:[%s2739_s22 + $0x28] sm:$0xff]  ;;  %v375_v8 = vld [vmem:[%s2723_s7 + $0x40] sm:$0xff]  ;;  %v377_v11 = vld [vmem:[%s2723_s7 + $0x50] sm:$0xff] }
  0x88   :  { %1565 = vmatprep.subr.bf16.mxu0 %v2058_v1  ;;  %v376_v9 = vld [vmem:[%s2723_s7 + $0x48] sm:$0xff]  ;;  %v378_v12 = vld [vmem:[%s2723_s7 + $0x58] sm:$0xff]  ;;  %v379_v14 = vld [vmem:[%s2723_s7 + $0x60] sm:$0xff] }
  0x89   :  { %1592 = vmatpush3.bf16.msra.mxu1 %v1589_v25  ;;  %v1625_v10 = vpack.c.bf16 %v376_v9, %v375_v8  ;;  %v1629_v13 = vpack.c.bf16 %v378_v12, %v377_v11  ;;  %v380_v15 = vld [vmem:[%s2723_s7 + $0x68] sm:$0xff]  ;;  %v381_v17 = vld [vmem:[%s2723_s7 + $0x70] sm:$0xff]  ;;  %v382_v18 = vld [vmem:[%s2723_s7 + $0x78] sm:$0xff] }
  0x8a   :  { %1594 = vmatprep.subr.bf16.mxu1 %v1593_v32  ;;  %v1633_v16 = vpack.c.bf16 %v380_v15, %v379_v14  ;;  %v1637_v19 = vpack.c.bf16 %v382_v18, %v381_v17  ;;  %v1266_v20 = vld [vmem:[%s2722_s6] ss:$0 sm:$0xff]  ;;  %v581_v51 = vld [vmem:[%s2725_s9 + $0x8] sm:$0xff]  ;;  %v582_v55 = vld [vmem:[%s2725_s9 + $0x10] sm:$0xff] }
  0x8b   :  { %1567 = vmatpush3.bf16.msra.mxu0 %v1566_v33  ;;  %v580_v50 = vld [vmem:[%s2725_s9] sm:$0xff]  ;;  %v583_v56 = vld [vmem:[%s2725_s9 + $0x18] sm:$0xff]  ;;  %v598_v60 = vld [vmem:[%s2726_s10 + $0x10] sm:$0xff] }
  0x8c   :  { %1568 = vmatprep.subr.bf16.mxu0 %v2058_v1  ;;  %v599_v61 = vld [vmem:[%s2726_s10 + $0x18] sm:$0xff]  ;;  %v584_v4 = vld [vmem:[%s2725_s9 + $0x20] sm:$0xff]  ;;  %v601_v9 = vld [vmem:[%s2726_s10 + $0x28] sm:$0xff] }
  0x8d   :  { %1596 = vmatpush3.bf16.msra.mxu1 %v1593_v32  ;;  %v1645_v3 = vpack.c.bf16 %v599_v61, %v598_v60  ;;  %v600_v8 = vld [vmem:[%s2726_s10 + $0x20] sm:$0xff]  ;;  %v586_v12 = vld [vmem:[%s2725_s9 + $0x30] sm:$0xff]  ;;  %v603_v15 = vld [vmem:[%s2726_s10 + $0x38] sm:$0xff] }
  0x8e   :  { %1598 = vmatprep.subr.bf16.mxu1 %v1597_v38  ;;  %v1648_v11 = vpack.c.bf16 %v601_v9, %v600_v8  ;;  %v602_v14 = vld [vmem:[%s2726_s10 + $0x30] sm:$0xff]  ;;  %v1267_v18 = vld [vmem:[#allocation2] ss:$0 sm:$0xff] }
  0x8f   :  { %1570 = vmatpush3.bf16.msra.mxu0 %v1569_v39  ;;  %v1651_v17 = vpack.c.bf16 %v603_v15, %v602_v14 }
  0x90   :  { %1571 = vmatprep.subr.bf16.mxu0 %v2058_v1 }
  0x91   :  { %1600 = vmatpush3.bf16.msra.mxu1 %v1597_v38 }
  0x92   :  { %1602 = vmatprep.subr.bf16.mxu1 %v1601_v44 }
  0x93   :  { %1573 = vmatpush3.bf16.msra.mxu0 %v1572_v45 }
  0x94   :  { %1574 = vmatprep.subr.bf16.mxu0 %v2058_v1 }
  0x95   :  { %1604 = vmatpush3.bf16.msra.mxu1 %v1601_v44 }
  0x96   :  { %1606 = vmatprep.subr.bf16.mxu1 %v1605_v52 }
  0x97   :  { %1576 = vmatpush3.bf16.msra.mxu0 %v1575_v53  ;;  %v1666_v53 = vpack.c.bf16 %v581_v51, %v580_v50 }
  0x98   :  { %1610 = vmatprep.subr.bf16.mxu0 %v1609_v54 }
  0x99   :  { %1608 = vmatpush3.bf16.msra.mxu1 %v1605_v52  ;;  %v596_v52 = vld [vmem:[%s2726_s10] sm:$0xff] }
  0x9a   :  { %1399 = vmatmul.mubr.f32.vlgmr.msra.gmra.mrb[0].mxu0 %v2278_v57  ;;  %1641 = vmatprep.subr.bf16.mxu1 %v2058_v1 }
  0x9b   :  { %1612 = vmatpush3.bf16.msra.mxu0 %v1609_v54  ;;  %v597_v54 = vld [vmem:[%s2726_s10 + $0x8] sm:$0xff] }
  0x9c   :  { %1434 = vmatmul.mubr.f32.vlgmr.msra.gmra.mrb[0].mxu1 %v2283_v59  ;;  %1614 = vmatprep.subr.bf16.mxu0 %v1613_v58 }
  0x9d   :  { %1436 = vmatprep.mubr.f32.mxu1 %v2295_v62 }
  0x9f   :  { %1616 = vmatpush3.bf16.msra.mxu0 %v1613_v58  ;;  %v1642_v58 = vpack.c.bf16 %v597_v54, %v596_v52 }
  0xa0   :  { %1437 = vmatmul.mubr.f32.gmra.mrb[2].mxu1 %v2303_v0  ;;  %1618 = vmatprep.subr.bf16.mxu0 %v1617_v63 }
  0xa1   :  { %1439 = vmatprep.mubr.f32.mxu1 %v2314_v5  ;;  %1643 = vmatpush3.bf16.msra.mxu1 %v1642_v58 }
  0xa2   :  { %1644 = vmatprep.subr.bf16.mxu1 %v2058_v1 }
  0xa3   :  { %1620 = vmatpush3.bf16.msra.mxu0 %v1617_v63  ;;  %v1669_v63 = vpack.c.bf16 %v583_v56, %v582_v55 }
  0xa4   :  { %1440 = vmatmul.mubr.f32.gmra.mrb[4].mxu1 %v2321_v7  ;;  %1622 = vmatprep.subr.bf16.mxu0 %v1621_v6 }
  0xa5   :  { %1515 = vmatprep.mubr.msk.f32.mxu1 %vm2059_vm0, %v2060_v2  ;;  %1646 = vmatpush3.bf16.msra.mxu1 %v1645_v3 }
  0xa6   :  { %1647 = vmatprep.subr.bf16.mxu1 %v2058_v1 }
  0xa7   :  { %1624 = vmatpush3.bf16.msra.mxu0 %v1621_v6  ;;  %v585_v6 = vld [vmem:[%s2725_s9 + $0x28] sm:$0xff] }
  0xa8   :  { %1626 = vmatprep.subr.bf16.mxu0 %v1625_v10 }
  0xa9   :  { %1649 = vmatpush3.bf16.msra.mxu1 %v1648_v11 }
  0xaa   :  { %1650 = vmatprep.subr.bf16.mxu1 %v2058_v1 }
  0xab   :  { %1628 = vmatpush3.bf16.msra.mxu0 %v1625_v10  ;;  %v1672_v10 = vpack.c.bf16 %v585_v6, %v584_v4 }
  0xac   :  { %1630 = vmatprep.subr.bf16.mxu0 %v1629_v13 }
  0xad   :  { %1652 = vmatpush3.bf16.msra.mxu1 %v1651_v17 }
  0xae   :  { %1653 = vmatprep.subr.bf16.mxu1 %v2058_v1 }
  0xaf   :  { %1632 = vmatpush3.bf16.msra.mxu0 %v1629_v13  ;;  %v587_v13 = vld [vmem:[%s2725_s9 + $0x38] sm:$0xff] }
  0xb0   :  { %1634 = vmatprep.subr.bf16.mxu0 %v1633_v16 }
  0xb3   :  { %1636 = vmatpush3.bf16.msra.mxu0 %v1633_v16  ;;  %v1675_v16 = vpack.c.bf16 %v587_v13, %v586_v12 }
  0xb4   :  { %1638 = vmatprep.subr.bf16.mxu0 %v1637_v19 }
  0xb7   :  { %1640 = vmatpush3.bf16.msra.mxu0 %v1637_v19 }
  0xb8   :  { %1665 = vmatprep.subr.bf16.mxu0 %v2058_v1 }
 0x16d   :  { %v234_v21 = vpop.f32.mrb[0].mxu0 }
 0x16e   :  { %v235_v22 = vadd.f32 %v1266_v20, %v234_v21  ;;  %v1400_v23 = vpop.f32.mrb[1].mxu0 }
 0x16f   :  { %v1435_v24 = vpop.f32.mrb[0].mxu1 }
 0x170   :  { %v326_v25 = vadd.f32 %v1435_v24, %v235_v22  ;;  %v320_v26 = vpop.f32.mrb[1].mxu1 }
 0x171   :  { %v321_v27 = vadd.f32 %v320_v26, %v235_v22 }
 0x172   :  { %vm350_vm1 = vcmp.gt.f32.partialorder %v326_v25, 0.0  ;;  %v356_v28 = vmul.f32 0.01, %v326_v25 }
 0x173   :  { %v355_v30 = vmul.f32 0.01, %v321_v27  ;;  %v1438_v31 = vpop.f32.mrb[2].mxu1  ;;  %vm349_vm2 = vcmp.gt.f32.partialorder %v321_v27, 0.0 }
 0x174   :  { %v336_v32 = vadd.f32 %v1438_v31, %v235_v22  ;;  %v330_v33 = vpop.f32.mrb[3].mxu1  ;;  %v362_v34 = vsel %vm350_vm1, %v326_v25, %v356_v28 }
 0x175   :  { %v331_v35 = vadd.f32 %v330_v33, %v235_v22  ;;  %v361_v36 = vsel %vm349_vm2, %v321_v27, %v355_v30 }
 0x176   :  { %v358_v37 = vmul.f32 0.01, %v336_v32  ;;  %1474 = vmatprep.mubr.f32.mxu0 %v361_v36  ;;  %vm352_vm4 = vcmp.gt.f32.partialorder %v336_v32, 0.0 }
 0x177   :  { %v357_v38 = vmul.f32 0.01, %v331_v35  ;;  %v1441_v39 = vpop.f32.mrb[4].mxu1  ;;  %1475 = vmatmul.mubr.f32.vlgmr.msra.gmra.mrb[2].mxu0 %v362_v34  ;;  %vm351_vm3 = vcmp.gt.f32.partialorder %v331_v35, 0.0 }
 0x178   :  { %v346_v40 = vadd.f32 %v1441_v39, %v235_v22  ;;  %v340_v41 = vpop.f32.mrb[5].mxu1  ;;  %v364_v45 = vsel %vm352_vm4, %v336_v32, %v358_v37  ;;  %1667 = vmatpush3.bf16.msra.mxu0 %v1666_v53 }
 0x179   :  { %v341_v42 = vadd.f32 %v340_v41, %v235_v22  ;;  %v363_v43 = vsel %vm351_vm3, %v331_v35, %v357_v38  ;;  %1668 = vmatprep.subr.bf16.mxu0 %v2058_v1  ;;  %vm1212_vm3 = vcmask 48128  }
 0x17a   :  { %v360_v44 = vmul.f32 0.01, %v346_v40  ;;  %1477 = vmatprep.mubr.f32.mxu0 %v363_v43  ;;  %vm354_vm6 = vcmp.gt.f32.partialorder %v346_v40, 0.0 }
 0x17b   :  { %v359_v46 = vmul.f32 0.01, %v341_v42  ;;  %1478 = vmatmul.mubr.f32.gmra.mrb[4].mxu0 %v364_v45  ;;  %vm353_vm5 = vcmp.gt.f32.partialorder %v341_v42, 0.0 }
 0x17c   :  { %v366_v48 = vsel %vm354_vm6, %v346_v40, %v360_v44  ;;  %1670 = vmatpush3.bf16.msra.mxu0 %v1669_v63 }
 0x17d   :  { %v365_v47 = vsel %vm353_vm5, %v341_v42, %v359_v46  ;;  %1671 = vmatprep.subr.bf16.mxu0 %v2058_v1  ;;  %vm1001_vm5 = vcmask 523264  }
 0x17e   :  { %1480 = vmatprep.mubr.f32.mxu0 %v365_v47 }
 0x17f   :  { %1481 = vmatmul.mubr.f32.gmra.mrb[6].mxu0 %v366_v48 }
 0x180   :  { %1550 = vmatprep.mubr.msk.f32.mxu0 %vm2059_vm0, %v2060_v2  ;;  %1673 = vmatpush3.bf16.msra.mxu0 %v1672_v10 }
 0x181   :  { %1674 = vmatprep.subr.bf16.mxu0 %v2058_v1 }
 0x184   :  { %1676 = vmatpush3.bf16.msra.mxu0 %v1675_v16 }
 0x185   :  { %1677 = vmatprep.subr.bf16.mxu0 %v2058_v1 }
 0x24a   :  { %v1476_v19 = vpop.f32.mrb[2].mxu0 }
 0x24b   :  { %v462_v20 = vadd.f32 %v1476_v19, %v1267_v18  ;;  %v456_v21 = vpop.f32.mrb[3].mxu0 }
 0x24c   :  { %v457_v22 = vadd.f32 %v1267_v18, %v456_v21 }
 0x24d   :  { %vm486_vm7 = vcmp.gt.f32.partialorder %v462_v20, 0.0  ;;  %v492_v23 = vmul.f32 0.01, %v462_v20 }
 0x24e   :  { %vm485_vm8 = vcmp.gt.f32.partialorder %v457_v22, 0.0  ;;  %v491_v24 = vmul.f32 0.01, %v457_v22  ;;  %v1479_v25 = vpop.f32.mrb[4].mxu0 }
 0x24f   :  { %v498_v26 = vsel %vm486_vm7, %v462_v20, %v492_v23  ;;  %v472_v27 = vadd.f32 %v1479_v25, %v1267_v18  ;;  %v466_v28 = vpop.f32.mrb[5].mxu0  ;;  %v588_v23 = vld [vmem:[%s2725_s9 + $0x40] sm:$0xff] }
 0x250   :  { %v497_v30 = vsel %vm485_vm8, %v457_v22, %v491_v24  ;;  %v467_v31 = vadd.f32 %v1267_v18, %v466_v28  ;;  %v589_v24 = vld [vmem:[%s2725_s9 + $0x48] sm:$0xff] }
 0x251   :  { %v503_v32 = vmax.f32 %v497_v30, %v498_v26  ;;  %v494_v33 = vmul.f32 0.01, %v472_v27  ;;  %vm488_vm10 = vcmp.gt.f32.partialorder %v472_v27, 0.0  ;;  %v1678_v25 = vpack.c.bf16 %v589_v24, %v588_v23 }
 0x252   :  { %vm487_vm9 = vcmp.gt.f32.partialorder %v467_v31, 0.0  ;;  %v493_v34 = vmul.f32 0.01, %v467_v31  ;;  %v1482_v35 = vpop.f32.mrb[6].mxu0 }
 0x253   :  { %v482_v36 = vadd.f32 %v1482_v35, %v1267_v18  ;;  %v476_v37 = vpop.f32.mrb[7].mxu0  ;;  %v500_v41 = vsel %vm488_vm10, %v472_v27, %v494_v33  ;;  %v605_v27 = vld [vmem:[%s2726_s10 + $0x48] sm:$0xff]  ;;  %1679 = vmatpush3.bf16.msra.mxu0 %v1678_v25  ;;  %v606_v33 = vld [vmem:[%s2726_s10 + $0x50] sm:$0xff] }
 0x254   :  { %v499_v38 = vsel %vm487_vm9, %v467_v31, %v493_v34  ;;  %v477_v39 = vadd.f32 %v1267_v18, %v476_v37  ;;  %1680 = vmatprep.subr.bf16.mxu0 %v2058_v1  ;;  %v591_v31 = vld [vmem:[%s2725_s9 + $0x58] sm:$0xff]  ;;  %v593_v37 = vld [vmem:[%s2725_s9 + $0x68] sm:$0xff] }
 0x255   :  { %v504_v40 = vmax.f32 %v503_v32, %v499_v38  ;;  %v496_v42 = vmul.f32 0.01, %v482_v36  ;;  %vm490_vm12 = vcmp.gt.f32.partialorder %v482_v36, 0.0  ;;  %v607_v34 = vld [vmem:[%s2726_s10 + $0x58] sm:$0xff] }
 0x256   :  { %vm489_vm11 = vcmp.gt.f32.partialorder %v477_v39, 0.0  ;;  %v495_v43 = vmul.f32 0.01, %v477_v39  ;;  %v1657_v35 = vpack.c.bf16 %v607_v34, %v606_v33 }
 0x257   :  { %v505_v44 = vmax.f32 %v504_v40, %v500_v41  ;;  %v502_v47 = vsel %vm490_vm12, %v482_v36, %v496_v42  ;;  %v592_v36 = vld [vmem:[%s2725_s9 + $0x60] sm:$0xff]  ;;  %v609_v40 = vld [vmem:[%s2726_s10 + $0x68] sm:$0xff]  ;;  %v594_v42 = vld [vmem:[%s2725_s9 + $0x70] sm:$0xff] }
 0x258   :  { %v501_v45 = vsel %vm489_vm11, %v477_v39, %v495_v43  ;;  %v608_v39 = vld [vmem:[%s2726_s10 + $0x60] sm:$0xff]  ;;  %v595_v43 = vld [vmem:[%s2725_s9 + $0x78] sm:$0xff] }
 0x259   :  { %v506_v46 = vmax.f32 %v505_v44, %v501_v45  ;;  %v1687_v44 = vpack.c.bf16 %v595_v43, %v594_v42  ;;  %v812_v42 = vld [vmem:[%s2729_s13 + $0x88] sm:$0xff] }
 0x25b   :  { %v507_v48 = vmax.f32 %v506_v46, %v502_v47  ;;  %v611_v46 = vld [vmem:[%s2726_s10 + $0x78] sm:$0xff] }
 0x25d   :  { %v508_v49 = vsub.f32 %v497_v30, %v507_v48  ;;  %v511_v50 = vsub.f32 %v498_v26, %v507_v48  ;;  %v517_v51 = vsub.f32 %v500_v41, %v507_v48  ;;  %v520_v52 = vsub.f32 %v501_v45, %v507_v48  ;;  %v604_v26 = vld [vmem:[%s2726_s10 + $0x40] sm:$0xff]  ;;  %v590_v30 = vld [vmem:[%s2725_s9 + $0x50] sm:$0xff] }
 0x25e   :  { %v523_v53 = vsub.f32 %v502_v47, %v507_v48  ;;  %v514_v54 = vsub.f32 %v499_v38, %v507_v48  ;;  %v1654_v28 = vpack.c.bf16 %v605_v27, %v604_v26  ;;  %v1681_v32 = vpack.c.bf16 %v591_v31, %v590_v30  ;;  %v610_v45 = vld [vmem:[%s2726_s10 + $0x70] sm:$0xff] }
 0x25f   :  { %v509_v55 = vmul.f32 1.442695, %v508_v49  ;;  %v512_v56 = vmul.f32 1.442695, %v511_v50  ;;  %v518_v60 = vmul.f32 1.442695, %v517_v51  ;;  %v1684_v38 = vpack.c.bf16 %v593_v37, %v592_v36 }
 0x260   :  { %v515_v58 = vmul.f32 1.442695, %v514_v54  ;;  %v521_v61 = vmul.f32 1.442695, %v520_v52  ;;  %v524_v63 = vmul.f32 1.442695, %v523_v53  ;;  %1655 = vmatpush3.bf16.msra.mxu1 %v1654_v28  ;;  %1682 = vmatpush3.bf16.msra.mxu0 %v1681_v32  ;;  %v1660_v41 = vpack.c.bf16 %v609_v40, %v608_v39 }
 0x261   :  { %1808 = vpow2.f32 %v509_v55  ;;  %1656 = vmatprep.subr.bf16.mxu1 %v2058_v1  ;;  %1683 = vmatprep.subr.bf16.mxu0 %v2058_v1  ;;  %v1663_v47 = vpack.c.bf16 %v611_v46, %v610_v45  ;;  %v579_v48 = vld [vmem:[#allocation8] sm:$0xff]  ;;  %v796_v49 = vld [vmem:[%s2729_s13 + $0x8] sm:$0xff]  ;;  %v803_v40 = vld [vmem:[%s2729_s13 + $0x40] sm:$0xff] }
 0x262   :  { %1810 = vpow2.f32 %v512_v56  ;;  %v798_v51 = vld [vmem:[%s2729_s13 + $0x18] sm:$0xff]  ;;  %v797_v53 = vld [vmem:[%s2729_s13 + $0x10] sm:$0xff]  ;;  %v811_v45 = vld [vmem:[%s2729_s13 + $0x80] sm:$0xff] }
 0x263   :  { %1812 = vpow2.f32 %v515_v58  ;;  %v802_v52 = vld [vmem:[%s2729_s13 + $0x38] sm:$0xff]  ;;  %v801_v55 = vld [vmem:[%s2729_s13 + $0x30] sm:$0xff]  ;;  %v815_v46 = vld [vmem:[%s2729_s13 + $0xa0] sm:$0xff] }
 0x264   :  { %1814 = vpow2.f32 %v518_v60  ;;  %1658 = vmatpush3.bf16.msra.mxu1 %v1657_v35  ;;  %1685 = vmatpush3.bf16.msra.mxu0 %v1684_v38  ;;  %v1721_v54 = vpack.c.bf16 %v802_v52, %v798_v51  ;;  %v1723_v56 = vpack.c.bf16 %v801_v55, %v797_v53  ;;  %v806_v58 = vld [vmem:[%s2729_s13 + $0x58] sm:$0xff]  ;;  %v804_v35 = vld [vmem:[%s2729_s13 + $0x48] sm:$0xff]  ;;  %v823_v51 = vld [vmem:[%s2729_s13 + $0xe0] sm:$0xff] }
 0x265   :  { %1816 = vpow2.f32 %v521_v61  ;;  %1659 = vmatprep.subr.bf16.mxu1 %v2058_v1  ;;  %1686 = vmatprep.subr.bf16.mxu0 %v2058_v1  ;;  %v810_v60 = vld [vmem:[%s2729_s13 + $0x78] sm:$0xff]  ;;  %v805_v61 = vld [vmem:[%s2729_s13 + $0x50] sm:$0xff]  ;;  %v828_v52 = vld [vmem:[%s2729_s13 + $0x108] sm:$0xff] }
 0x266   :  { %1818 = vpow2.f32 %v524_v63  ;;  %v1725_v63 = vpack.c.bf16 %v810_v60, %v806_v58  ;;  %v832_v53 = vld [vmem:[%s2729_s13 + $0x128] sm:$0xff]  ;;  %v831_v58 = vld [vmem:[%s2729_s13 + $0x120] sm:$0xff] }
 0x267   :  { %v1705_v55 = vpack.c.bf16 %v832_v53, %v828_v52  ;;  %v836_v60 = vld [vmem:[%s2729_s13 + $0x148] sm:$0xff]  ;;  %v833_v52 = vld [vmem:[%s2729_s13 + $0x130] sm:$0xff] }
 0x268   :  { %1661 = vmatpush3.bf16.msra.mxu1 %v1660_v41  ;;  %1688 = vmatpush3.bf16.msra.mxu0 %v1687_v44  ;;  %v807_v41 = vld [vmem:[%s2729_s13 + $0x60] sm:$0xff]  ;;  %v766_v53 = vld [vmem:[#allocation12 + $0x18] sm:$0xff] }
 0x269   :  { %1662 = vmatprep.subr.bf16.mxu1 %v2058_v1  ;;  %v800_v1 = vld [vmem:[%s2729_s13 + $0x28] sm:$0xff]  ;;  %1722 = vmatprep.subr.bf16.mxu0 %v1721_v54  ;;  %v1695_v43 = vpack.c.bf16 %v807_v41, %v803_v40  ;;  %v821_v41 = vld [vmem:[%s2729_s13 + $0xd0] sm:$0xff] }
 0x26a   :  { %v1689_v50 = vpack.c.bf16 %v800_v1, %v796_v49  ;;  %v1699_v49 = vpack.c.bf16 %v815_v46, %v811_v45  ;;  %v787_v45 = vld [vmem:[#allocation12 + $0xc0] sm:$0xff] }
 0x26b   :  { %v1809_v3 = vpop.eup %1808  ;;  %1551 = vmatmul.mubr.f32.vlgmr.msra.gmra.mrb[8].mxu0 %v579_v48  ;;  %v824_v48 = vld [vmem:[%s2729_s13 + $0xe8] sm:$0xff]  ;;  %v791_v46 = vld [vmem:[#allocation12 + $0xe0] sm:$0xff] }
 0x26c   :  { %v1811_v4 = vpop.eup %1810  ;;  %1664 = vmatpush3.bf16.msra.mxu1 %v1663_v47  ;;  %994 = vmatprep.mubr.f32.mxu0 %v2060_v2  ;;  %v820_v47 = vld [vmem:[%s2729_s13 + $0xc8] sm:$0xff] }
 0x26d   :  { %v526_v6 = vadd.f32 %v1811_v4, %v1809_v3  ;;  %v1813_v8 = vpop.eup %1812  ;;  %1690 = vmatprep.subr.bf16.mxu1 %v1689_v50  ;;  %1724 = vmatpush1.bf16.msra.mxu0 %v1723_v56  ;;  %v1701_v1 = vpack.c.bf16 %v824_v48, %v820_v47  ;;  %v819_v50 = vld [vmem:[%s2729_s13 + $0xc0] sm:$0xff]  ;;  %v1767_v48 = vpack.c.bf16 %v791_v46, %v787_v45 }
 0x26e   :  { %v1815_v10 = vpop.eup %1814  ;;  %1726 = vmatprep.subr.bf16.mxu0 %v1725_v63  ;;  %v1703_v54 = vpack.c.bf16 %v823_v51, %v819_v50  ;;  %v827_v56 = vld [vmem:[%s2729_s13 + $0x100] sm:$0xff]  ;;  %v829_v50 = vld [vmem:[%s2729_s13 + $0x110] sm:$0xff] }
 0x26f   :  { %v527_v9 = vadd.f32 %v1813_v8, %v526_v6  ;;  %v1817_v12 = vpop.eup %1816  ;;  %v814_v6 = vld [vmem:[%s2729_s13 + $0x98] sm:$0xff]  ;;  %v1707_v63 = vpack.c.bf16 %v831_v58, %v827_v56 }
 0x270   :  { %v1819_v14 = vpop.eup %1818  ;;  %v838_v58 = vld [vmem:[%s2729_s13 + $0x158] sm:$0xff] }
 0x271   :  { %v528_v11 = vadd.f32 %v1815_v10, %v527_v9 }
 0x273   :  { %v529_v13 = vadd.f32 %v1817_v12, %v528_v11  ;;  %v817_v11 = vld [vmem:[%s2729_s13 + $0xb0] sm:$0xff] }
 0x275   :  { %v530_v15 = vadd.f32 %v1819_v14, %v529_v13  ;;  %v1149_v13 = vlaneseq }
 0x277   :  { %1820 = vrcp.f32 %v530_v15 }
 0x281   :  { %v1821_v16 = vpop.eup %1820 }
 0x282   :  { %v534_v17 = vmul.f32 %v1821_v16, %v1813_v8  ;;  %v532_v18 = vmul.f32 %v1821_v16, %v1809_v3  ;;  %v535_v19 = vmul.f32 %v1821_v16, %v1815_v10  ;;  %v533_v20 = vmul.f32 %v1821_v16, %v1811_v4  ;;  %v809_v3 = vld [vmem:[%s2729_s13 + $0x70] sm:$0xff]  ;;  %v818_v8 = vld [vmem:[%s2729_s13 + $0xb8] sm:$0xff] }
 0x283   :  { %v537_v21 = vmul.f32 %v1821_v16, %v1819_v14  ;;  %v536_v22 = vmul.f32 %v1821_v16, %v1817_v12  ;;  %v1727_v4 = vpack.c.bf16 %v809_v3, %v805_v61  ;;  %v1729_v9 = vpack.c.bf16 %v818_v8, %v814_v6  ;;  %v813_v10 = vld [vmem:[%s2729_s13 + $0x90] sm:$0xff]  ;;  %v840_v61 = vld [vmem:[%s2729_s13 + $0x168] sm:$0xff]  ;;  %v839_v6 = vld [vmem:[%s2729_s13 + $0x160] sm:$0xff] }
 0x284   :  { %553 = vperm.xlu1 %1807, %v534_v17   ;;  %540 = vperm.xlu0 %1806, %v532_v18   ;;  %v1731_v12 = vpack.c.bf16 %v817_v11, %v813_v10  ;;  %v1199_v14 = vand.u32 127, %v1149_v13  ;;  %v1709_v3 = vpack.c.bf16 %v840_v61, %v836_v60  ;;  %v844_v8 = vld [vmem:[%s2729_s13 + $0x188] sm:$0xff]  ;;  %v842_v60 = vld [vmem:[%s2729_s13 + $0x178] sm:$0xff]  ;;  %v837_v61 = vld [vmem:[%s2729_s13 + $0x150] sm:$0xff] }
 0x285   :  { %1728 = vmatpush1.bf16.msra.mxu0 %v1727_v4  ;;  %v835_v4 = vld [vmem:[%s2729_s13 + $0x140] sm:$0xff] }
 0x286   :  { %1730 = vmatprep.subr.bf16.mxu0 %v1729_v9  ;;  %vm1200_vm13 = vcmp.eq.s32.totalorder %v1199_v14, 0  ;;  %vm1202_vm14 = vcmp.eq.s32.totalorder %v1199_v14, 1  ;;  %vm1204_vm15 = vcmp.eq.s32.totalorder %v1199_v14, 2  ;;  %vm1206_vm0 = vcmp.eq.s32.totalorder %v1199_v14, 3  ;;  %v848_v9 = vld [vmem:[%s2729_s13 + $0x1a8] sm:$0xff] }
 0x287   :  { %vm1208_vm1 = vcmp.eq.s32.totalorder %v1199_v14, 4  ;;  %vm1210_vm2 = vcmp.eq.s32.totalorder %v1199_v14, 5  ;;  %v1711_v10 = vpack.c.bf16 %v839_v6, %v835_v4  ;;  %v1713_v11 = vpack.c.bf16 %v848_v9, %v844_v8  ;;  %v847_v14 = vld [vmem:[%s2729_s13 + $0x1a0] sm:$0xff]  ;;  %v846_v6 = vld [vmem:[%s2729_s13 + $0x198] sm:$0xff]  ;;  %v845_v9 = vld [vmem:[%s2729_s13 + $0x190] sm:$0xff] }
 0x288   :  { %560 = vperm.xlu1 %1807, %v535_v19   ;;  %546 = vperm.xlu0 %1806, %v533_v20   ;;  %v850_v8 = vld [vmem:[%s2729_s13 + $0x1b8] sm:$0xff] }
 0x289   :  { %1732 = vmatpush1.bf16.msra.mxu0 %v1731_v12  ;;  %v843_v12 = vld [vmem:[%s2729_s13 + $0x180] sm:$0xff] }
 0x28c   :  { %574 = vperm.xlu1 %1807, %v537_v21   ;;  %567 = vperm.xlu0 %1806, %v536_v22  }
 0x303   :  { %v554_v15 = vpop.permute.xlu1 %553  ;;  %v541_v16 = vpop.permute.xlu0 %540 }
 0x304   :  { %v1201_v17 = vsel %vm1200_vm13, %v541_v16, 0.0  ;;  %v543_v20 = vmul.f32 %v541_v16, %v2258_v29  ;;  %v556_v24 = vmul.f32 %v2295_v62, %v554_v15  ;;  %v799_v62 = vld [vmem:[%s2729_s13 + $0x20] sm:$0xff]  ;;  %v856_v16 = vld [vmem:[%s2729_s13 + $0x1e8] sm:$0xff] }
 0x307   :  { %v561_v18 = vpop.permute.xlu1 %560  ;;  %v547_v19 = vpop.permute.xlu0 %546 }
 0x308   :  { %v549_v21 = vmul.f32 %v2283_v59, %v547_v19  ;;  %v1203_v22 = vsel %vm1202_vm14, %v547_v19, %v1201_v17  ;;  %v563_v30 = vmul.f32 %v2303_v0, %v561_v18  ;;  %v795_v59 = vld [vmem:[%s2729_s13] sm:$0xff]  ;;  %v808_v0 = vld [vmem:[%s2729_s13 + $0x68] sm:$0xff]  ;;  %v1715_v17 = vpack.c.bf16 %v847_v14, %v843_v12  ;;  %v854_v14 = vld [vmem:[%s2729_s13 + $0x1d8] sm:$0xff] }
 0x309   :  { %v1205_v23 = vsel %vm1204_vm15, %v554_v15, %v1203_v22  ;;  %v1691_v37 = vpack.c.bf16 %v799_v62, %v795_v59  ;;  %v1693_v39 = vpack.c.bf16 %v808_v0, %v804_v35  ;;  %v852_v15 = vld [vmem:[%s2729_s13 + $0x1c8] sm:$0xff]  ;;  %v851_v19 = vld [vmem:[%s2729_s13 + $0x1c0] sm:$0xff] }
 0x30a   :  { %v550_v25 = vadd.f32 %v549_v21, %v543_v20  ;;  %v1207_v26 = vsel %vm1206_vm0, %v561_v18, %v1205_v23  ;;  %v1717_v18 = vpack.c.bf16 %v856_v16, %v852_v15  ;;  %v855_v20 = vld [vmem:[%s2729_s13 + $0x1e0] sm:$0xff]  ;;  %v858_v15 = vld [vmem:[%s2729_s13 + $0x1f8] sm:$0xff]  ;;  %v853_v16 = vld [vmem:[%s2729_s13 + $0x1d0] sm:$0xff] }
 0x30b   :  { %v575_v27 = vpop.permute.xlu1 %574  ;;  %v568_v28 = vpop.permute.xlu0 %567  ;;  %v764_v21 = vld [vmem:[#allocation12 + $0x8] sm:$0xff]  ;;  %v1719_v23 = vpack.c.bf16 %v855_v20, %v851_v19  ;;  %v779_v35 = vld [vmem:[#allocation12 + $0x80] sm:$0xff] }
 0x30c   :  { %v557_v31 = vadd.f32 %v556_v24, %v550_v25  ;;  %v1209_v32 = vsel %vm1208_vm1, %v568_v28, %v1207_v26  ;;  %v570_v29 = vmul.f32 %v2314_v5, %v568_v28  ;;  %v577_v36 = vmul.f32 %v2321_v7, %v575_v27  ;;  %v816_v7 = vld [vmem:[%s2729_s13 + $0xa8] sm:$0xff]  ;;  %v763_v25 = vld [vmem:[#allocation12] sm:$0xff] }
 0x30d   :  { %v1211_v33 = vsel %vm1210_vm2, %v575_v27, %v1209_v32  ;;  %v1697_v44 = vpack.c.bf16 %v816_v7, %v812_v42  ;;  %v768_v22 = vld [vmem:[#allocation12 + $0x28] sm:$0xff]  ;;  %v767_v26 = vld [vmem:[#allocation12 + $0x20] sm:$0xff]  ;;  %v825_v42 = vld [vmem:[%s2729_s13 + $0xf0] sm:$0xff] }
 0x30e   :  { %v564_v34 = vadd.f32 %v563_v30, %v557_v31  ;;  %1213 = vst.msk [vmem:[#allocation14] sm:$0xff] %vm1212_vm3, %v1211_v33  ;;  %v1753_v24 = vpack.c.bf16 %v768_v22, %v764_v21  ;;  %v772_v27 = vld [vmem:[#allocation12 + $0x48] sm:$0xff]  ;;  %v1755_v30 = vpack.c.bf16 %v767_v26, %v763_v25  ;;  %v771_v32 = vld [vmem:[#allocation12 + $0x40] sm:$0xff]  ;;  %v769_v25 = vld [vmem:[#allocation12 + $0x30] sm:$0xff] }
 0x30f   :  { %v776_v28 = vld [vmem:[#allocation12 + $0x68] sm:$0xff]  ;;  %v775_v33 = vld [vmem:[#allocation12 + $0x60] sm:$0xff] }
 0x310   :  { %v571_v5 = vadd.f32 %v570_v29, %v564_v34  ;;  %v1757_v31 = vpack.c.bf16 %v776_v28, %v772_v27  ;;  %v780_v34 = vld [vmem:[#allocation12 + $0x88] sm:$0xff]  ;;  %v1759_v59 = vpack.c.bf16 %v775_v33, %v771_v32  ;;  %v783_v0 = vld [vmem:[#allocation12 + $0xa0] sm:$0xff]  ;;  %v774_v27 = vld [vmem:[#allocation12 + $0x58] sm:$0xff] }
 0x311   :  { %v784_v29 = vld [vmem:[#allocation12 + $0xa8] sm:$0xff]  ;;  %v1268_v21 = vld [vmem:[%s2727_s11] ss:$0 sm:$0xff]  ;;  %v778_v28 = vld [vmem:[#allocation12 + $0x78] sm:$0xff]  ;;  %s2062_s11 = smov [#allocation14]  }
 0x312   :  { %v578_v38 = vadd.f32 %v577_v36, %v571_v5  ;;  %v1761_v62 = vpack.c.bf16 %v784_v29, %v780_v34  ;;  %v1763_v36 = vpack.c.bf16 %v783_v0, %v779_v35  ;;  %v788_v7 = vld [vmem:[#allocation12 + $0xc8] sm:$0xff]  ;;  %v1773_v32 = vpack.c.bf16 %v778_v28, %v774_v27  ;;  %v773_v33 = vld [vmem:[#allocation12 + $0x50] sm:$0xff]  ;;  %v782_v29 = vld [vmem:[#allocation12 + $0x98] sm:$0xff] }
 0x313   :  { %v777_v34 = vld [vmem:[#allocation12 + $0x70] sm:$0xff] }
 0x314   :  { %1516 = vmatmul.mubr.f32.vlgmr.msra.gmra.mrb[6].mxu1 %v578_v38  ;;  %v826_v38 = vld [vmem:[%s2729_s13 + $0xf8] sm:$0xff]  ;;  %v781_v0 = vld [vmem:[#allocation12 + $0x90] sm:$0xff] }
 0x315   :  { %1692 = vmatpush1.bf16.msra.mxu1 %v1691_v37  ;;  %923 = vmatprep.mubr.f32.mxu1 %v2060_v2  ;;  %v822_v37 = vld [vmem:[%s2729_s13 + $0xd8] sm:$0xff] }
 0x316   :  { %1694 = vmatprep.subr.bf16.mxu1 %v1693_v39  ;;  %v1733_v40 = vpack.c.bf16 %v826_v38, %v822_v37  ;;  %v794_v37 = vld [vmem:[#allocation12 + $0xf8] sm:$0xff] }
 0x318   :  { %1734 = vmatprep.subr.bf16.mxu0 %v1733_v40  ;;  %v789_v40 = vld [vmem:[#allocation12 + $0xd0] sm:$0xff] }
 0x319   :  { %1696 = vmatpush1.bf16.msra.mxu1 %v1695_v43  ;;  %v1735_v43 = vpack.c.bf16 %v825_v42, %v821_v41  ;;  %v793_v41 = vld [vmem:[#allocation12 + $0xf0] sm:$0xff] }
 0x31a   :  { %1698 = vmatprep.subr.bf16.mxu1 %v1697_v44  ;;  %v792_v44 = vld [vmem:[#allocation12 + $0xe8] sm:$0xff]  ;;  %v1783_v42 = vpack.c.bf16 %v793_v41, %v789_v40 }
 0x31b   :  { %v1765_v47 = vpack.c.bf16 %v792_v44, %v788_v7  ;;  %1736 = vmatpush1.bf16.msra.mxu0 %v1735_v43 }
 0x31d   :  { %1700 = vmatpush1.bf16.msra.mxu1 %v1699_v49  ;;  %v830_v49 = vld [vmem:[%s2729_s13 + $0x118] sm:$0xff] }
 0x31e   :  { %1702 = vmatprep.subr.bf16.mxu1 %v1701_v1  ;;  %v834_v1 = vld [vmem:[%s2729_s13 + $0x138] sm:$0xff] }
 0x31f   :  { %v1737_v51 = vpack.c.bf16 %v834_v1, %v830_v49 }
 0x321   :  { %1704 = vmatpush1.bf16.msra.mxu1 %v1703_v54  ;;  %v770_v54 = vld [vmem:[#allocation12 + $0x38] sm:$0xff]  ;;  %1738 = vmatprep.subr.bf16.mxu0 %v1737_v51 }
 0x322   :  { %1706 = vmatprep.subr.bf16.mxu1 %v1705_v55  ;;  %v1739_v55 = vpack.c.bf16 %v833_v52, %v829_v50  ;;  %v1769_v56 = vpack.c.bf16 %v770_v54, %v766_v53 }
 0x324   :  { %1740 = vmatpush1.bf16.msra.mxu0 %v1739_v55 }
 0x325   :  { %1708 = vmatpush1.bf16.msra.mxu1 %v1707_v63  ;;  %v1741_v63 = vpack.c.bf16 %v842_v60, %v838_v58 }
 0x326   :  { %1710 = vmatprep.subr.bf16.mxu1 %v1709_v3  ;;  %v841_v3 = vld [vmem:[%s2729_s13 + $0x170] sm:$0xff] }
 0x327   :  { %v1743_v4 = vpack.c.bf16 %v841_v3, %v837_v61  ;;  %1742 = vmatprep.subr.bf16.mxu0 %v1741_v63 }
 0x329   :  { %1712 = vmatpush1.bf16.msra.mxu1 %v1711_v10  ;;  %1744 = vmatpush1.bf16.msra.mxu0 %v1743_v4  ;;  %v1745_v10 = vpack.c.bf16 %v850_v8, %v846_v6 }
 0x32a   :  { %1714 = vmatprep.subr.bf16.mxu1 %v1713_v11  ;;  %v849_v11 = vld [vmem:[%s2729_s13 + $0x1b0] sm:$0xff] }
 0x32b   :  { %v1747_v12 = vpack.c.bf16 %v849_v11, %v845_v9  ;;  %1746 = vmatprep.subr.bf16.mxu0 %v1745_v10 }
 0x32d   :  { %1716 = vmatpush1.bf16.msra.mxu1 %v1715_v17  ;;  %1748 = vmatpush1.bf16.msra.mxu0 %v1747_v12  ;;  %v1749_v17 = vpack.c.bf16 %v858_v15, %v854_v14 }
 0x32e   :  { %1718 = vmatprep.subr.bf16.mxu1 %v1717_v18  ;;  %v857_v18 = vld [vmem:[%s2729_s13 + $0x1f0] sm:$0xff]  ;;  %s1222_s13 = sshll.u32 %s2062_s11, 4  ;;  %s1223_s13 = int_to_ptr.vmem [resolvable:$true] %s1222_s13 }
 0x32f   :  { %v1751_v19 = vpack.c.bf16 %v857_v18, %v853_v16  ;;  %1750 = vmatprep.subr.bf16.mxu0 %v1749_v17  ;;  %s1970_s28 = scalar_lea.vmem %s1223_s13, 128  ;;  %p1975_p7 = scmp.lt.s32.totalorder %s1223_s13, %s1223_s13 }
 0x330   :  { %p1971_p6 = scmp.ne.s32.totalorder %s1223_s13, %s1970_s28  ;;  %p1976_p8 = scmp.lt.s32.totalorder %s1970_s28, %s1970_s28 }
 0x331   :  { %1720 = vmatpush1.bf16.msra.mxu1 %v1719_v23  ;;  %1752 = vmatpush1.bf16.msra.mxu0 %v1751_v19 }
 0x332   :  { %1754 = vmatprep.subr.bf16.mxu1 %v1753_v24  ;;  %v765_v24 = vld [vmem:[#allocation12 + $0x10] sm:$0xff]  ;;  %p1977_p9 = por %p1976_p8, %p1975_p7 }
 0x334   :  { %924 = vmatmul.mubr.f32.vlgmr.msra.gmra.mrb[8].mxu1 %v2278_v57  ;;  %995 = vmatmul.mubr.f32.vlgmr.msra.gmra.mrb[10].mxu0 %v2278_v57  ;;  %p1978_p10 = pnand %p1977_p9, %p1971_p6 }
 0x335   :  { %1756 = vmatpush1.bf16.msra.mxu1 %v1755_v30  ;;  %1069 = vmatprep.mubr.f32.mxu1 %v2060_v2 }
 0x336   :  { %1758 = vmatprep.subr.bf16.mxu1 %v1757_v31  ;;  %v1771_v31 = vpack.c.bf16 %v769_v25, %v765_v24 }
 0x339   :  { %1760 = vmatpush1.bf16.msra.mxu1 %v1759_v59  ;;  %v786_v59 = vld [vmem:[#allocation12 + $0xb8] sm:$0xff] }
 0x33a   :  { %1762 = vmatprep.subr.bf16.mxu1 %v1761_v62  ;;  %v1775_v62 = vpack.c.bf16 %v777_v34, %v773_v33  ;;  %v1777_v35 = vpack.c.bf16 %v786_v59, %v782_v29 }
 0x33d   :  { %1764 = vmatpush1.bf16.msra.mxu1 %v1763_v36  ;;  %v785_v36 = vld [vmem:[#allocation12 + $0xb0] sm:$0xff] }
 0x33e   :  { %v748_v5 = vpop.f32.mrb[8].mxu0  ;;  %1766 = vmatprep.subr.bf16.mxu1 %v1765_v47  ;;  %v1779_v38 = vpack.c.bf16 %v785_v36, %v781_v0 }
 0x33f   :  { %v1552_v39 = vpop.f32.mrb[9].mxu0 }
 0x341   :  { %1768 = vmatpush1.bf16.msra.mxu1 %v1767_v48 }
 0x342   :  { %1770 = vmatprep.subr.bf16.mxu1 %v1769_v56 }
 0x3e7   :  { %v678_v20 = vpop.f32.mrb[6].mxu1 }
 0x3e8   :  { %v749_v22 = vadd.f32 %v748_v5, %v678_v20  ;;  %v1517_v23 = vpop.f32.mrb[7].mxu1  ;;  %v790_v5 = vld [vmem:[#allocation12 + $0xd8] sm:$0xff] }
 0x3e9   :  { %v1781_v39 = vpack.c.bf16 %v794_v37, %v790_v5 }
 0x3ea   :  { %v759_v26 = vadd.f32 %v1268_v21, %v749_v22 }
 0x3ec   :  { %vm760_vm4 = vcmp.gt.f32.partialorder %v759_v26, 0.0  ;;  %v761_v30 = vmul.f32 0.01, %v759_v26 }
 0x3ee   :  { %v762_v57 = vsel %vm760_vm4, %v759_v26, %v761_v30 }
 0x3ef   :  { %1269 = vmatmul.mubr.msk.f32.vlgmr.msra.gmra.mrb[8].mxu1 %vm1001_vm5, %v762_v57 }
 0x3f0   :  { %1772 = vmatpush1.bf16.msra.mxu1 %v1771_v31  ;;  %1140 = vmatprep.mubr.f32.mxu1 %v2060_v2 }
 0x3f1   :  { %1774 = vmatprep.subr.bf16.mxu1 %v1773_v32 }
 0x3f4   :  { %1776 = vmatpush1.bf16.msra.mxu1 %v1775_v62 }
 0x3f5   :  { %1778 = vmatprep.subr.bf16.mxu1 %v1777_v35 }
 0x3f8   :  { %1780 = vmatpush1.bf16.msra.mxu1 %v1779_v38 }
 0x3f9   :  { %1782 = vmatprep.subr.bf16.mxu1 %v1781_v39 }
 0x3fc   :  { %1784 = vmatpush1.bf16.msra.mxu1 %v1783_v42 }
 0x3ff   :  { %1270 = vmatmul.mubr.msk.f32.vlgmr.msra.gmra.mrb[10].mxu1 %vm1001_vm5, %v762_v57 }
 0x407   :  { %v996_v7 = vpop.f32.mrb[10].mxu0 }
 0x408   :  { %v998_v2 = vpop.f32.mrb[11].mxu0 }
 0x409   :  { %1981 = shalt.err (!%p1978_p10)
}
 0x40a   :  { %s1982_s7 = scalar_lea.hbm %s2731_s15, 128 }
 0x40b   :  { %p1983_p11 = scmp.ne.s32.totalorder %s2731_s15, %s1982_s7  ;;  %p1986_p12 = scmp.lt.u32.totalorder %s1982_s7, %s2731_s15 }
 0x40d   :  { %p1988_p13 = pnand %p1986_p12, %p1983_p11 }
 0x40f   :  { %1991 = shalt.err (!%p1988_p13)
}
 0x410   :  { %1225 = dma.vmem_to_hbm [thread:$0]  %s1223_s13, 128, %s2731_s15, [#allocation5]   ;;  %v1150_v43 = vshrl.u32 %v1149_v13, 7  ;;  %v1147_v45 = vld [vmem:[%s2730_s14] sm:$0xf]  ;;  %v1192_v16 = vld [vmem:[#allocation6] sm:$0xff] }
 0x411   :  { %s2063_s14 = smov [#allocation15]   ;;  %s2064_s8 = smov [#allocation17]  }
 0x412   :  { %v1151_v44 = vsub.s32 0, %v1150_v43  ;;  %v1155_v46 = vsub.s32 1, %v1150_v43  ;;  %v1159_v56 = vsub.s32 2, %v1150_v43  ;;  %v1163_v13 = vsub.s32 3, %v1150_v43  ;;  %s1232_s15 = sshll.u32 %s2063_s14, 4  ;;  %s1242_s1 = sshll.u32 %s2064_s8, 4  ;;  %s1233_s15 = int_to_ptr.vmem [resolvable:$true] %s1232_s15  ;;  %s1243_s1 = int_to_ptr.vmem [resolvable:$true] %s1242_s1 }
 0x413   :  { %s1992_s22 = scalar_lea.vmem %s1233_s15, 128  ;;  %p1997_p1 = scmp.lt.s32.totalorder %s1233_s15, %s1233_s15 }
 0x414   :  { %v1152_v47 = vrot.slane %v1147_v45, %v1151_v44  ;;  %v1156_v48 = vrot.slane %v1147_v45, %v1155_v46  ;;  %v1160_v58 = vrot.slane %v1147_v45, %v1159_v56  ;;  %v1164_v61 = vrot.slane %v1147_v45, %v1163_v13  ;;  %p1993_p0 = scmp.ne.s32.totalorder %s1233_s15, %s1992_s22  ;;  %p1998_p2 = scmp.lt.s32.totalorder %s1992_s22, %s1992_s22 }
 0x416   :  { %p1999_p3 = por %p1998_p2, %p1997_p1 }
 0x418   :  { %p2000_p4 = pnand %p1999_p3, %p1993_p0 }
 0x4c2   :  { %v1071_v49 = vpop.f32.mrb[8].mxu1 }
 0x4c3   :  { %v1169_v1 = vadd.f32 %v1152_v47, %v1071_v49  ;;  %v1073_v50 = vpop.f32.mrb[9].mxu1 }
 0x4c4   :  { %v1170_v51 = vadd.f32 %v1156_v48, %v1073_v50 }
 0x4c5   :  { %v1173_v52 = vsub.f32 0.0, %v1169_v1 }
 0x4c6   :  { %v1179_v53 = vsub.f32 0.0, %v1170_v51 }
 0x4c7   :  { %v1174_v54 = vmul.f32 1.442695, %v1173_v52 }
 0x4c8   :  { %v1180_v55 = vmul.f32 1.442695, %v1179_v53 }
 0x4c9   :  { %1822 = vpow2.f32 %v1174_v54 }
 0x4ca   :  { %1824 = vpow2.f32 %v1180_v55 }
 0x4d2   :  { %v1142_v60 = vpop.f32.mrb[10].mxu1 }
 0x4d3   :  { %v1823_v63 = vpop.eup %1822  ;;  %v1143_v3 = vadd.f32 %v1142_v60, %v996_v7  ;;  %v1144_v4 = vpop.f32.mrb[11].mxu1 }
 0x4d4   :  { %v1825_v6 = vpop.eup %1824  ;;  %v1176_v8 = vadd.f32 1.0, %v1823_v63  ;;  %v1145_v9 = vadd.f32 %v1144_v4, %v998_v2 }
 0x4d5   :  { %v1182_v10 = vadd.f32 1.0, %v1825_v6  ;;  %v1171_v11 = vadd.f32 %v1160_v58, %v1143_v3 }
 0x4d6   :  { %1826 = vrcp.f32 %v1176_v8  ;;  %v1172_v12 = vadd.f32 %v1164_v61, %v1145_v9 }
 0x4d7   :  { %1828 = vrcp.f32 %v1182_v10 }
 0x4d8   :  { %1830 = vtanh.f32 %v1171_v11  ;;  %v1186_v14 = vsub.f32 0.0, %v1172_v12 }
 0x4da   :  { %v1187_v15 = vmul.f32 1.442695, %v1186_v14 }
 0x4dc   :  { %1832 = vpow2.f32 %v1187_v15 }
 0x4e0   :  { %v1827_v17 = vpop.eup %1826 }
 0x4e1   :  { %v1829_v18 = vpop.eup %1828 }
 0x4e2   :  { %v1831_v19 = vpop.eup %1830  ;;  %v1193_v20 = vmul.f32 %v1829_v18, %v1192_v16 }
 0x4e3   :  { %v1194_v21 = vmul.f32 %v1831_v19, %v1827_v17 }
 0x4e5   :  { %v1195_v22 = vadd.f32 %v1194_v21, %v1193_v20 }
 0x4e6   :  { %v1833_v23 = vpop.eup %1832 }
 0x4e7   :  { %1215 = vst [vmem:[#allocation17] sm:$0xff] %v1195_v22  ;;  %v1189_v24 = vadd.f32 1.0, %v1833_v23  ;;  %1834 = vtanh.f32 %v1195_v22 }
 0x4e9   :  { %1836 = vrcp.f32 %v1189_v24 }
 0x4f1   :  { %v1835_v25 = vpop.eup %1834 }
 0x4f3   :  { %v1837_v26 = vpop.eup %1836 }
 0x4f4   :  { %v1197_v27 = vmul.f32 %v1837_v26, %v1835_v25 }
 0x4f6   :  { %1214 = vst [vmem:[#allocation15] sm:$0xff] %v1197_v27 }
 0x4f7   :  { %2003 = shalt.err (!%p2000_p4)
}
 0x4f8   :  { %s2004_s2 = scalar_lea.hbm %s2732_s16, 128 }
 0x4f9   :  { %p2005_p5 = scmp.ne.s32.totalorder %s2732_s16, %s2004_s2  ;;  %p2008_p6 = scmp.lt.u32.totalorder %s2004_s2, %s2732_s16 }
 0x4fb   :  { %p2010_p7 = pnand %p2008_p6, %p2005_p5 }
 0x4fd   :  { %2013 = shalt.err (!%p2010_p7)
}
 0x4fe   :  { %1235 = dma.vmem_to_hbm [thread:$0]  %s1233_s15, 128, %s2732_s16, [#allocation16]  }
 0x4ff   :  { %s2014_s25 = scalar_lea.vmem %s1243_s1, 128  ;;  %p2019_p9 = scmp.lt.s32.totalorder %s1243_s1, %s1243_s1 }
 0x500   :  { %p2015_p8 = scmp.ne.s32.totalorder %s1243_s1, %s2014_s25  ;;  %p2020_p10 = scmp.lt.s32.totalorder %s2014_s25, %s2014_s25 }
 0x502   :  { %p2021_p11 = por %p2020_p10, %p2019_p9 }
 0x504   :  { %p2022_p12 = pnand %p2021_p11, %p2015_p8 }
 0x506   :  { %2025 = shalt.err (!%p2022_p12)
}
 0x507   :  { %s2026_s28 = scalar_lea.hbm %s2733_s17, 128 }
 0x508   :  { %p2027_p13 = scmp.ne.s32.totalorder %s2733_s17, %s2026_s28  ;;  %p2030_p0 = scmp.lt.u32.totalorder %s2026_s28, %s2733_s17 }
 0x50a   :  { %p2032_p1 = pnand %p2030_p0, %p2027_p13 }
 0x50c   :  { %2035 = shalt.err (!%p2032_p1)
}
 0x50d   :  { %1245 = dma.vmem_to_hbm [thread:$0]  %s1243_s1, 128, %s2733_s17, [#allocation16]  }
 0x50e   :  { %2044 = dma.done.wait [#allocation5], 128  }
 0x50f   :  { %2045 = vsyncadd [#allocation5], 4294967168 }
 0x510   :  { %2046 = dma.done.wait [#allocation16], 256  }
 0x511   :  { %2047 = vsyncadd [#allocation16], 4294967040 }
 0x512   :  { %1255 = vsyncpa [#allocation4], 1 }
 0x513   :  { %1256 = vsyncpa [#allocation7], 1 }
 0x514   :  { %1257 = vsyncpa [#allocation10], 1 }
 0x515   :  { %1258 = vsyncpa [#allocation13], 1 }
 0x516   :  { %1259 = vsyncpa [#allocation5], 1 }
 0x517   :  { %1260 = vsyncpa [#allocation16], 1 }

</bundles_post_ra>
